<compile_context>
chip_gen: v7x
topology: tpu7x:2x2x1
jax: 0.10.0
libtpu: 0.0.40
codegen_flags: <defaults>
</compile_context>

<pallas_src>
import math
from functools import partial

import jax
import jax.numpy as jnp
from jax.experimental import pallas as pl
from jax.experimental.pallas import tpu as pltpu


# ----------------------------------------------------------------------------
# Attention head (glue): global-avg-pool -> fc -> relu -> 4 small heads.
# Matches Attention.forward for the non-skip configuration (groups=1, K>1, kernel_num>1).
# ----------------------------------------------------------------------------
def attention_forward(x_nchw, p, temperature=1.0):
    pooled = jnp.mean(x_nchw, axis=(2, 3))                                       # (B, C_in)
    hidden = jax.nn.relu(pooled @ p["fc_w"].T + p["fc_b"])                       # (B, A)
    ca = jax.nn.sigmoid((hidden @ p["ch_w"].T + p["ch_b"]) / temperature)        # (B, C_in)
    fa = jax.nn.sigmoid((hidden @ p["fil_w"].T + p["fil_b"]) / temperature)      # (B, C_out)
    sa = jax.nn.sigmoid((hidden @ p["sp_w"].T + p["sp_b"]) / temperature)        # (B, K*K)
    ka = jax.nn.softmax((hidden @ p["k_w"].T + p["k_b"]) / temperature, axis=1)  # (B, Knum)
    return ca, fa, sa, ka


# ----------------------------------------------------------------------------
# Pallas kernel.  Grid = (batch b, output-row tile t), both "parallel".
#   w_ref   : VMEM (1, K*K*C_in_p, C_out_p) bf16 = pre-aggregated dynamic weight (per batch)
#   fa_ref  : VMEM (1, 1, C_out_p)          f32  = filter attention (zero-padded channels)
#   x_ref   : VMEM (1, Hp, Wp, C_in_p)      bf16 = padded input, whole image (per batch)
#   o_ref   : VMEM (1, 1, TILE_OH*OW, C_out_p)   = lane-dense output slab for this row tile
#   col_ref : VMEM scratch (TILE_OH, OW, K*K*C_in_p) bf16 = im2col buffer
# ----------------------------------------------------------------------------
def _odconv_kernel(w_ref, fa_ref, x_ref, o_ref, col_ref, *, K, TILE_OH, OW, dil, C_in_p):
    t = pl.program_id(1)
    row0 = t * TILE_OH                                       # stride == 1

    # --- 1) im2col of this output-row tile.  All destination lane offsets are multiples
    #        of 128 (C_in_p % 128 == 0) and full lane width -> unmasked, lane-dense stores.
    for kh in range(K):
        for kw in range(K):
            kk = kh * K + kw
            col_ref[:, :, kk * C_in_p:(kk + 1) * C_in_p] = x_ref[
                0, pl.ds(row0 + kh * dil, TILE_OH), kw * dil:kw * dil + OW, :]

    # --- 2) One fat MXU matmul: (TILE_OH*OW, K*K*C_in_p) @ (K*K*C_in_p, C_out_p), f32 acc.
    col = col_ref[...].reshape(TILE_OH * OW, K * K * C_in_p)
    out = jnp.dot(col, w_ref[0], preferred_element_type=jnp.float32)

    # --- 3) Filter attention on the f32 accumulator (matches reference: fa applied after
    #        the conv, in f32), then a lane-dense store.
    out = out * fa_ref[0]
    o_ref[0, 0] = out.astype(o_ref.dtype)


def _round_up(v, m):
    return ((v + m - 1) // m) * m


# ----------------------------------------------------------------------------
# Wrapper: ODConv2d.forward (common path, bias=False).
# ----------------------------------------------------------------------------
def odconv2d_pallas(x, params, *, kernel_size, stride=1, padding=0, dilation=1,
                    groups=1, kernel_num=4, temperature=1.0, tile_oh=None, out_dtype=None):
    assert groups == 1, "kernel implements groups=1"
    assert stride == 1, "kernel implements stride=1"
    # TODO(synk): stride>1 / groups>1, bias, and the 1x1 'skip' attention branches are
    # not implemented (the common _forward_impl_common path only).

    B, C_in, H, W = x.shape
    K = kernel_size
    KK = K * K
    C_out = params["weight"].shape[1]
    C_in_p = _round_up(C_in, 128)                          # lane-aligned im2col / x loads
    C_out_p = _round_up(C_out, 128)                        # lane-dense output stores
    KKC_p = KK * C_in_p
    out_dtype = x.dtype if out_dtype is None else out_dtype
    out_itemsize = jnp.dtype(out_dtype).itemsize

    ca, fa, sa, ka = attention_forward(x, params, temperature)

    OH = (H + 2 * padding - dilation * (K - 1) - 1) // stride + 1
    OW = (W + 2 * padding - dilation * (K - 1) - 1) // stride + 1
    Wp = W + 2 * padding

    # ---- per-chip VMEM budget (v5e/v6e: 128 MiB, v7x: 64 MiB) -------------------------
    try:
        phys_vmem = getattr(pltpu.get_tpu_info(), "vmem_capacity_bytes",
                            64 * 1024 * 1024)
    except Exception:                                      # pragma: no cover
        phys_vmem = 64 * 1024 * 1024
    vmem_budget = int(phys_vmem * 0.6)

    def vmem_footprint(t_oh):
        nt_ = -(-OH // t_oh)
        hp_ = nt_ * t_oh + dilation * (K - 1)
        x_block = hp_ * Wp * C_in_p * 2                    # bf16, resident per batch
        w_block = KKC_p * C_out_p * 2                      # bf16 aggregated weight
        fa_block = C_out_p * 4
        o_block = t_oh * OW * C_out_p * out_itemsize
        col_block = t_oh * OW * KKC_p * 2
        return 2 * (x_block + w_block + fa_block + o_block) + col_block   # 2x = double buffer

    # ---- tile selection: M = TILE_OH*OW >= ~512, shrink if over VMEM budget ------------
    if tile_oh is None:
        TILE_OH = min(OH, max(8, -(-512 // OW)))
    else:
        TILE_OH = min(tile_oh, OH)
    while TILE_OH > 1 and vmem_footprint(TILE_OH) > vmem_budget:
        TILE_OH -= 1
    # TODO(synk): if the whole padded image does not fit VMEM (very large H*W*C_in_p),
    # switch x to a manually DMA'd row window (pl.ANY + make_async_copy double buffer)
    # and/or pl.Buffered(3) on the x BlockSpec to deepen the batch-boundary prefetch.

    nt = -(-OH // TILE_OH)
    OH_p = nt * TILE_OH                                    # row-padded output height

    # ---- input: NCHW -> NHWC bf16, pad spatially + channel-pad to C_in_p ---------------
    x_nhwc = jnp.transpose(x, (0, 2, 3, 1)).astype(jnp.bfloat16)
    Hp_needed = OH_p + dilation * (K - 1)
    pad_bottom = Hp_needed - (H + padding)                 # >= padding
    x_pad = jnp.pad(x_nhwc, ((0, 0), (padding, pad_bottom), (padding, padding),
                             (0, C_in_p - C_in)))
    Hp, Wp = x_pad.shape[1], x_pad.shape[2]

    # ---- per-batch aggregated dynamic weight (glue, hoisted out of the kernel) ---------
    #   agg[b, kk, ci, co] = sum_n ka[b,n] * sa[b,kk] * ca[b,ci] * w[n, co, ci, kk]
    # (x*ca conv W == x conv (W*ca); filter attention stays OUT and is applied in f32
    #  post-matmul inside the kernel.)
    w = params["weight"].astype(jnp.float32)               # (Knum, C_out, C_in, K, K)
    w_flat = w.reshape(kernel_num, C_out, C_in, KK)
    wk = jnp.einsum("bn,nocs->bocs", ka, w_flat,
                    precision=jax.lax.Precision.HIGHEST)   # (B, C_out, C_in, KK)
    agg = wk * sa[:, None, None, :] * ca[:, None, :, None]
    agg = jnp.transpose(agg, (0, 3, 2, 1))                 # (B, KK, C_in, C_out)
    agg = jnp.pad(agg, ((0, 0), (0, 0), (0, C_in_p - C_in), (0, C_out_p - C_out)))
    wagg = agg.reshape(B, KKC_p, C_out_p).astype(jnp.bfloat16)

    fa_p = jnp.pad(fa.astype(jnp.float32), ((0, 0), (0, C_out_p - C_out)))[:, None, :]

    kernel = partial(_odconv_kernel, K=K, TILE_OH=TILE_OH, OW=OW, dil=dilation,
                     C_in_p=C_in_p)

    flops = 2 * B * nt * TILE_OH * OW * KKC_p * C_out_p
    bytes_accessed = int(x_pad.size * 2 + wagg.size * 2 + fa_p.size * 4
                         + B * nt * TILE_OH * OW * C_out_p * out_itemsize)
    vmem_limit = int(min(max(vmem_footprint(TILE_OH) + (8 << 20), 32 << 20), 128 << 20))

    out_tiles = pl.pallas_call(
        kernel,
        out_shape=jax.ShapeDtypeStruct((B, nt, TILE_OH * OW, C_out_p), out_dtype),
        grid_spec=pltpu.PrefetchScalarGridSpec(
            num_scalar_prefetch=0,
            grid=(B, nt),
            in_specs=[
                pl.BlockSpec((1, KKC_p, C_out_p), lambda b, t: (b, 0, 0)),       # wagg (per b)
                pl.BlockSpec((1, 1, C_out_p), lambda b, t: (b, 0, 0)),           # filter attn
                pl.BlockSpec((1, Hp, Wp, C_in_p), lambda b, t: (b, 0, 0, 0)),    # x (per b)
            ],
            out_specs=pl.BlockSpec((1, 1, TILE_OH * OW, C_out_p),
                                   lambda b, t: (b, t, 0, 0)),
            scratch_shapes=[pltpu.VMEM((TILE_OH, OW, KKC_p), jnp.bfloat16)],     # im2col
        ),
        compiler_params=pltpu.CompilerParams(
            dimension_semantics=("parallel", "parallel"),
            vmem_limit_bytes=vmem_limit),
        cost_estimate=pl.CostEstimate(flops=flops, transcendentals=0,
                                      bytes_accessed=bytes_accessed),
    )(wagg, fa_p, x_pad)

    out = out_tiles.reshape(B, OH_p, OW, C_out_p)[:, :OH, :, :C_out]
    # TODO(synk): for an NHWC end-to-end model return `out` directly (skip the transpose)
    # and pass out_dtype=jnp.bfloat16 to halve writeback HBM traffic.
    return jnp.transpose(out, (0, 3, 1, 2)).astype(x.dtype)


# ----------------------------------------------------------------------------
# Pure-JAX reference (mirrors ODConv2d._forward_impl_common) for verification.
# ----------------------------------------------------------------------------
def odconv2d_reference(x, params, *, kernel_size, stride=1, padding=0, dilation=1,
                       kernel_num=4, temperature=1.0):
    B = x.shape[0]
    K = kernel_size
    ca, fa, sa, ka = attention_forward(x, params, temperature)
    xs = x * ca[:, :, None, None]
    w = params["weight"]                                          # (Knum, C_out, C_in, K, K)
    agg = jnp.einsum("bn,nocij,bij->bocij", ka, w, sa.reshape(B, K, K),
                     precision=jax.lax.Precision.HIGHEST)         # (B, C_out, C_in, K, K)

    def conv_one(xb, wb):
        return jax.lax.conv_general_dilated(
            xb[None], wb, window_strides=(stride, stride),
            padding=[(padding, padding), (padding, padding)],
            rhs_dilation=(dilation, dilation),
            dimension_numbers=("NCHW", "OIHW", "NCHW"),
            precision=jax.lax.Precision.HIGHEST)[0]

    out = jax.vmap(conv_one)(xs, agg)
    return out * fa[:, :, None, None]


# ----------------------------------------------------------------------------
# Deterministic parameter init (shapes from ODConv2d.__init__ / Attention.__init__).
# ----------------------------------------------------------------------------
def init_params(key, in_planes, out_planes, kernel_size, kernel_num,
                reduction=0.0625, min_channel=16):
    attn_ch = max(int(in_planes * reduction), min_channel)
    ks = jax.random.split(key, 6)

    def kaiming_linear(k, out_c, in_c):            # 1x1 conv, kaiming fan_out, relu gain
        std = math.sqrt(2.0 / out_c)
        return std * jax.random.normal(k, (out_c, in_c), jnp.float32)

    std_w = math.sqrt(2.0 / (out_planes * kernel_size * kernel_size))
    weight = std_w * jax.random.normal(
        ks[5], (kernel_num, out_planes, in_planes, kernel_size, kernel_size), jnp.float32)

    return {
        "fc_w": kaiming_linear(ks[0], attn_ch, in_planes),
        "fc_b": jnp.zeros((attn_ch,), jnp.float32),
        "ch_w": kaiming_linear(ks[1], in_planes, attn_ch),
        "ch_b": jnp.zeros((in_planes,), jnp.float32),
        "fil_w": kaiming_linear(ks[2], out_planes, attn_ch),
        "fil_b": jnp.zeros((out_planes,), jnp.float32),
        "sp_w": kaiming_linear(ks[3], kernel_size * kernel_size, attn_ch),
        "sp_b": jnp.zeros((kernel_size * kernel_size,), jnp.float32),
        "k_w": kaiming_linear(ks[4], kernel_num, attn_ch),
        "k_b": jnp.zeros((kernel_num,), jnp.float32),
        "weight": weight,
    }


if __name__ == "__main__":
    key = jax.random.PRNGKey(0)

    def run_case(k, *, B, C_in, H, W, C_out, K, KNUM, stride, padding, dilation,
                 tile_oh, tag):
        kx, kp = jax.random.split(k)
        x = jax.random.normal(kx, (B, C_in, H, W), jnp.float32)
        params = init_params(kp, C_in, C_out, K, KNUM)
        out = odconv2d_pallas(x, params, kernel_size=K, stride=stride, padding=padding,
                              dilation=dilation, groups=1, kernel_num=KNUM,
                              tile_oh=tile_oh)
        out = jax.block_until_ready(out)
        ref = odconv2d_reference(x, params, kernel_size=K, stride=stride, padding=padding,
                                 dilation=dilation, kernel_num=KNUM)
        assert out.shape == ref.shape, (tag, out.shape, ref.shape)
        if not jnp.allclose(out, ref, atol=2e-2, rtol=2e-2):
            max_diff = float(jnp.max(jnp.abs(out - ref)))
            raise AssertionError(f"{tag}: Pallas ODConv2d mismatch, max|diff|={max_diff}")

    k1, k2 = jax.random.split(key)
    # Canonical small case (K=3, pad=1, single row tile).
    run_case(k1, B=2, C_in=4, H=16, W=16, C_out=8, K=3, KNUM=4,
             stride=1, padding=1, dilation=1, tile_oh=None, tag="case1")
    # Exercises C_in/C_out lane padding, dilation>1 and a tail row tile (OH % TILE_OH != 0).
    run_case(k2, B=1, C_in=8, H=18, W=18, C_out=16, K=3, KNUM=4,
             stride=1, padding=1, dilation=2, tile_oh=6, tag="case2")

    print("KERNEL_OK")
</pallas_src>

<mosaic_0001>
module attributes {stable_mosaic.version = 11 : i64} {
  func.func @_odconv_kernel(%arg0: i32, %arg1: i32, %arg2: memref<1x1152x128xbf16, #tpu.memory_space<vmem>>, %arg3: memref<1x1x128xf32, #tpu.memory_space<vmem>>, %arg4: memref<1x18x18x128xbf16, #tpu.memory_space<vmem>>, %arg5: memref<1x1x256x128xf32, #tpu.memory_space<vmem>>, %arg6: memref<16x16x1152xbf16, #tpu.memory_space<vmem>>) attributes {dimension_semantics = [#tpu.dimension_semantics<parallel>, #tpu.dimension_semantics<parallel>], iteration_bounds = array<i64: 2, 1>, scalar_prefetch = 0 : i64, scratch_operands = 1 : i64, tpu.core_type = #tpu.core_type<tc>, window_params = [{transform_indices = @transform_0, window_bounds = array<i64: 1, 1152, 128>}, {transform_indices = @transform_1, window_bounds = array<i64: 1, 1, 128>}, {transform_indices = @transform_2, window_bounds = array<i64: 1, 18, 18, 128>}, {transform_indices = @transform_3, window_bounds = array<i64: 1, 1, 256, 128>}]} {
    %c16_i32 = arith.constant 16 : i32
    %0 = arith.muli %arg1, %c16_i32 : i32
    %c0_i32 = arith.constant 0 : i32
    %1 = arith.addi %0, %c0_i32 : i32
    %c0 = arith.constant 0 : index
    %2 = arith.index_cast %1 : i32 to index
    %c0_0 = arith.constant 0 : index
    %c0_1 = arith.constant 0 : index
    %3 = vector.load %arg4[%c0, %2, %c0_0, %c0_1] : memref<1x18x18x128xbf16, #tpu.memory_space<vmem>>, vector<1x16x16x128xbf16>
    %4 = vector.shape_cast %3 : vector<1x16x16x128xbf16> to vector<16x16x128xbf16>
    %c0_2 = arith.constant 0 : index
    %c0_3 = arith.constant 0 : index
    %c0_4 = arith.constant 0 : index
    %5 = vector.load %arg6[%c0_2, %c0_3, %c0_4] : memref<16x16x1152xbf16, #tpu.memory_space<vmem>>, vector<16x16x128xbf16>
    tpu.vector_store %arg6[%c0_2, %c0_3, %c0_4], %4 {strides = array<i32>} : memref<16x16x1152xbf16, #tpu.memory_space<vmem>>, vector<16x16x128xbf16>,
    %c0_i32_5 = arith.constant 0 : i32
    %6 = arith.addi %0, %c0_i32_5 : i32
    %c0_6 = arith.constant 0 : index
    %7 = arith.index_cast %6 : i32 to index
    %c1 = arith.constant 1 : index
    %c0_7 = arith.constant 0 : index
    %8 = vector.load %arg4[%c0_6, %7, %c1, %c0_7] : memref<1x18x18x128xbf16, #tpu.memory_space<vmem>>, vector<1x16x16x128xbf16>
    %9 = vector.shape_cast %8 : vector<1x16x16x128xbf16> to vector<16x16x128xbf16>
    %c0_8 = arith.constant 0 : index
    %c0_9 = arith.constant 0 : index
    %c128 = arith.constant 128 : index
    %10 = vector.load %arg6[%c0_8, %c0_9, %c128] : memref<16x16x1152xbf16, #tpu.memory_space<vmem>>, vector<16x16x128xbf16>
    tpu.vector_store %arg6[%c0_8, %c0_9, %c128], %9 {strides = array<i32>} : memref<16x16x1152xbf16, #tpu.memory_space<vmem>>, vector<16x16x128xbf16>,
    %c0_i32_10 = arith.constant 0 : i32
    %11 = arith.addi %0, %c0_i32_10 : i32
    %c0_11 = arith.constant 0 : index
    %12 = arith.index_cast %11 : i32 to index
    %c2 = arith.constant 2 : index
    %c0_12 = arith.constant 0 : index
    %13 = vector.load %arg4[%c0_11, %12, %c2, %c0_12] : memref<1x18x18x128xbf16, #tpu.memory_space<vmem>>, vector<1x16x16x128xbf16>
    %14 = vector.shape_cast %13 : vector<1x16x16x128xbf16> to vector<16x16x128xbf16>
    %c0_13 = arith.constant 0 : index
    %c0_14 = arith.constant 0 : index
    %c256 = arith.constant 256 : index
    %15 = vector.load %arg6[%c0_13, %c0_14, %c256] : memref<16x16x1152xbf16, #tpu.memory_space<vmem>>, vector<16x16x128xbf16>
    tpu.vector_store %arg6[%c0_13, %c0_14, %c256], %14 {strides = array<i32>} : memref<16x16x1152xbf16, #tpu.memory_space<vmem>>, vector<16x16x128xbf16>,
    %c1_i32 = arith.constant 1 : i32
    %16 = arith.addi %0, %c1_i32 : i32
    %c0_15 = arith.constant 0 : index
    %17 = arith.index_cast %16 : i32 to index
    %c0_16 = arith.constant 0 : index
    %c0_17 = arith.constant 0 : index
    %18 = vector.load %arg4[%c0_15, %17, %c0_16, %c0_17] : memref<1x18x18x128xbf16, #tpu.memory_space<vmem>>, vector<1x16x16x128xbf16>
    %19 = vector.shape_cast %18 : vector<1x16x16x128xbf16> to vector<16x16x128xbf16>
    %c0_18 = arith.constant 0 : index
    %c0_19 = arith.constant 0 : index
    %c384 = arith.constant 384 : index
    %20 = vector.load %arg6[%c0_18, %c0_19, %c384] : memref<16x16x1152xbf16, #tpu.memory_space<vmem>>, vector<16x16x128xbf16>
    tpu.vector_store %arg6[%c0_18, %c0_19, %c384], %19 {strides = array<i32>} : memref<16x16x1152xbf16, #tpu.memory_space<vmem>>, vector<16x16x128xbf16>,
    %c1_i32_20 = arith.constant 1 : i32
    %21 = arith.addi %0, %c1_i32_20 : i32
    %c0_21 = arith.constant 0 : index
    %22 = arith.index_cast %21 : i32 to index
    %c1_22 = arith.constant 1 : index
    %c0_23 = arith.constant 0 : index
    %23 = vector.load %arg4[%c0_21, %22, %c1_22, %c0_23] : memref<1x18x18x128xbf16, #tpu.memory_space<vmem>>, vector<1x16x16x128xbf16>
    %24 = vector.shape_cast %23 : vector<1x16x16x128xbf16> to vector<16x16x128xbf16>
    %c0_24 = arith.constant 0 : index
    %c0_25 = arith.constant 0 : index
    %c512 = arith.constant 512 : index
    %25 = vector.load %arg6[%c0_24, %c0_25, %c512] : memref<16x16x1152xbf16, #tpu.memory_space<vmem>>, vector<16x16x128xbf16>
    tpu.vector_store %arg6[%c0_24, %c0_25, %c512], %24 {strides = array<i32>} : memref<16x16x1152xbf16, #tpu.memory_space<vmem>>, vector<16x16x128xbf16>,
    %c1_i32_26 = arith.constant 1 : i32
    %26 = arith.addi %0, %c1_i32_26 : i32
    %c0_27 = arith.constant 0 : index
    %27 = arith.index_cast %26 : i32 to index
    %c2_28 = arith.constant 2 : index
    %c0_29 = arith.constant 0 : index
    %28 = vector.load %arg4[%c0_27, %27, %c2_28, %c0_29] : memref<1x18x18x128xbf16, #tpu.memory_space<vmem>>, vector<1x16x16x128xbf16>
    %29 = vector.shape_cast %28 : vector<1x16x16x128xbf16> to vector<16x16x128xbf16>
    %c0_30 = arith.constant 0 : index
    %c0_31 = arith.constant 0 : index
    %c640 = arith.constant 640 : index
    %30 = vector.load %arg6[%c0_30, %c0_31, %c640] : memref<16x16x1152xbf16, #tpu.memory_space<vmem>>, vector<16x16x128xbf16>
    tpu.vector_store %arg6[%c0_30, %c0_31, %c640], %29 {strides = array<i32>} : memref<16x16x1152xbf16, #tpu.memory_space<vmem>>, vector<16x16x128xbf16>,
    %c2_i32 = arith.constant 2 : i32
    %31 = arith.addi %0, %c2_i32 : i32
    %c0_32 = arith.constant 0 : index
    %32 = arith.index_cast %31 : i32 to index
    %c0_33 = arith.constant 0 : index
    %c0_34 = arith.constant 0 : index
    %33 = vector.load %arg4[%c0_32, %32, %c0_33, %c0_34] : memref<1x18x18x128xbf16, #tpu.memory_space<vmem>>, vector<1x16x16x128xbf16>
    %34 = vector.shape_cast %33 : vector<1x16x16x128xbf16> to vector<16x16x128xbf16>
    %c0_35 = arith.constant 0 : index
    %c0_36 = arith.constant 0 : index
    %c768 = arith.constant 768 : index
    %35 = vector.load %arg6[%c0_35, %c0_36, %c768] : memref<16x16x1152xbf16, #tpu.memory_space<vmem>>, vector<16x16x128xbf16>
    tpu.vector_store %arg6[%c0_35, %c0_36, %c768], %34 {strides = array<i32>} : memref<16x16x1152xbf16, #tpu.memory_space<vmem>>, vector<16x16x128xbf16>,
    %c2_i32_37 = arith.constant 2 : i32
    %36 = arith.addi %0, %c2_i32_37 : i32
    %c0_38 = arith.constant 0 : index
    %37 = arith.index_cast %36 : i32 to index
    %c1_39 = arith.constant 1 : index
    %c0_40 = arith.constant 0 : index
    %38 = vector.load %arg4[%c0_38, %37, %c1_39, %c0_40] : memref<1x18x18x128xbf16, #tpu.memory_space<vmem>>, vector<1x16x16x128xbf16>
    %39 = vector.shape_cast %38 : vector<1x16x16x128xbf16> to vector<16x16x128xbf16>
    %c0_41 = arith.constant 0 : index
    %c0_42 = arith.constant 0 : index
    %c896 = arith.constant 896 : index
    %40 = vector.load %arg6[%c0_41, %c0_42, %c896] : memref<16x16x1152xbf16, #tpu.memory_space<vmem>>, vector<16x16x128xbf16>
    tpu.vector_store %arg6[%c0_41, %c0_42, %c896], %39 {strides = array<i32>} : memref<16x16x1152xbf16, #tpu.memory_space<vmem>>, vector<16x16x128xbf16>,
    %c2_i32_43 = arith.constant 2 : i32
    %41 = arith.addi %0, %c2_i32_43 : i32
    %c0_44 = arith.constant 0 : index
    %42 = arith.index_cast %41 : i32 to index
    %c2_45 = arith.constant 2 : index
    %c0_46 = arith.constant 0 : index
    %43 = vector.load %arg4[%c0_44, %42, %c2_45, %c0_46] : memref<1x18x18x128xbf16, #tpu.memory_space<vmem>>, vector<1x16x16x128xbf16>
    %44 = vector.shape_cast %43 : vector<1x16x16x128xbf16> to vector<16x16x128xbf16>
    %c0_47 = arith.constant 0 : index
    %c0_48 = arith.constant 0 : index
    %c1024 = arith.constant 1024 : index
    %45 = vector.load %arg6[%c0_47, %c0_48, %c1024] : memref<16x16x1152xbf16, #tpu.memory_space<vmem>>, vector<16x16x128xbf16>
    tpu.vector_store %arg6[%c0_47, %c0_48, %c1024], %44 {strides = array<i32>} : memref<16x16x1152xbf16, #tpu.memory_space<vmem>>, vector<16x16x128xbf16>,
    %c0_49 = arith.constant 0 : index
    %c0_50 = arith.constant 0 : index
    %c0_51 = arith.constant 0 : index
    %46 = vector.load %arg6[%c0_49, %c0_50, %c0_51] : memref<16x16x1152xbf16, #tpu.memory_space<vmem>>, vector<16x16x1152xbf16>
    %47 = vector.shape_cast %46 : vector<16x16x1152xbf16> to vector<256x1152xbf16>
    %c0_52 = arith.constant 0 : index
    %c0_53 = arith.constant 0 : index
    %c0_54 = arith.constant 0 : index
    %48 = vector.load %arg2[%c0_52, %c0_53, %c0_54] : memref<1x1152x128xbf16, #tpu.memory_space<vmem>>, vector<1x1152x128xbf16>
    %49 = vector.shape_cast %48 : vector<1x1152x128xbf16> to vector<1152x128xbf16>
    %cst = arith.constant dense<0.000000e+00> : vector<256x128xf32>
    %50 = tpu.matmul %47, %49, %cst {dimension_numbers = #tpu.dot_dimension_numbers<[1], [0], [0], [1], [0, 0, 1, 1], [], []>} : vector<256x1152xbf16>, vector<1152x128xbf16>, vector<256x128xf32> -> vector<256x128xf32>
    %c0_55 = arith.constant 0 : index
    %c0_56 = arith.constant 0 : index
    %c0_57 = arith.constant 0 : index
    %51 = vector.load %arg3[%c0_55, %c0_56, %c0_57] : memref<1x1x128xf32, #tpu.memory_space<vmem>>, vector<1x1x128xf32>
    %52 = vector.shape_cast %51 : vector<1x1x128xf32> to vector<1x128xf32>
    %53 = vector.broadcast %52 : vector<1x128xf32> to vector<256x128xf32>
    %54 = arith.mulf %50, %53 : vector<256x128xf32>
    %c0_58 = arith.constant 0 : index
    %c0_59 = arith.constant 0 : index
    %c0_60 = arith.constant 0 : index
    %c0_61 = arith.constant 0 : index
    %55 = vector.load %arg5[%c0_58, %c0_59, %c0_60, %c0_61] : memref<1x1x256x128xf32, #tpu.memory_space<vmem>>, vector<1x1x256x128xf32>
    %56 = vector.shape_cast %55 : vector<1x1x256x128xf32> to vector<256x128xf32>
    %57 = vector.shape_cast %54 : vector<256x128xf32> to vector<1x1x256x128xf32>
    tpu.vector_store %arg5[%c0_58, %c0_59, %c0_60, %c0_61], %57 {strides = array<i32>} : memref<1x1x256x128xf32, #tpu.memory_space<vmem>>, vector<1x1x256x128xf32>,
    return
  }
  func.func @transform_0(%arg0: i32, %arg1: i32) -> (i32, i32, i32) {
    %c0_i32 = arith.constant 0 : i32
    %c0_i32_0 = arith.constant 0 : i32
    %c0_i32_1 = arith.constant 0 : i32
    return %arg0, %c0_i32, %c0_i32_0 : i32, i32, i32
  }
  func.func @transform_1(%arg0: i32, %arg1: i32) -> (i32, i32, i32) {
    %c0_i32 = arith.constant 0 : i32
    %c0_i32_0 = arith.constant 0 : i32
    %c0_i32_1 = arith.constant 0 : i32
    return %arg0, %c0_i32, %c0_i32_0 : i32, i32, i32
  }
  func.func @transform_2(%arg0: i32, %arg1: i32) -> (i32, i32, i32, i32) {
    %c0_i32 = arith.constant 0 : i32
    %c0_i32_0 = arith.constant 0 : i32
    %c0_i32_1 = arith.constant 0 : i32
    %c0_i32_2 = arith.constant 0 : i32
    return %arg0, %c0_i32, %c0_i32_0, %c0_i32_1 : i32, i32, i32, i32
  }
  func.func @transform_3(%arg0: i32, %arg1: i32) -> (i32, i32, i32, i32) {
    %c0_i32 = arith.constant 0 : i32
    %c0_i32_0 = arith.constant 0 : i32
    %c0_i32_1 = arith.constant 0 : i32
    return %arg0, %arg1, %c0_i32, %c0_i32_0 : i32, i32, i32, i32
  }
}

</mosaic_0001>

<bundles_post_ra>
// kernel: tpu_custom_call.1
= control target key start
LH: loop header
LB: loop body
LE: loop exit
PB: predicated region body
PF: predicated region fallthrough
CT: control target
= control target key end

     0   :  { %8 = vsyncpa [#allocation4], 0  ;;  %s7025_s0 = inlined_call_operand.hbm [shape: bf16[2,1152,128], index: 0, kind: input, shape index: {}]   ;;  %s7026_s1 = inlined_call_operand.vmem [shape: f32[2,1,128], index: 1, kind: input, shape index: {}]   ;;  %s7027_s2 = inlined_call_operand.vmem [shape: bf16[2,18,18,128], index: 2, kind: input, shape index: {}]   ;;  %s7028_s3 = inlined_call_operand.hbm [shape: f32[2,1,256,128], index: 3, kind: output, shape index: {}]  }
   0x1   :  { %10 = vsyncpa [#allocation4 + $0x1], 0 }
   0x2   :  { %11 = vsyncpa [#allocation5], 0 }
   0x3   :  { %13 = vsyncpa [#allocation5 + $0x1], 0  ;;  %s6020_s12 = smov 0   ;;  %s6022_s13 = smov 0  }
   0x4   :  { %s6024_s14 = smov 0   ;;  %s6026_s15 = smov 0  }
   0x5   :  { %s6028_s16 = smov 0   ;;  %s6030_s17 = smov 0  }
   0x6 LB: > { %s4379_s18 = sadd.s32 4294967295, %s5992_s17   ;;  %s4380_s19 = sadd.s32 4294967294, %s5992_s17   ;;  %s5992_s17 = sphi %s6030_s17, %s19_s17   ;;  %s5988_s16 = sphi %s6028_s16, %s7043_s16   ;;  %s5984_s15 = sphi %s6026_s15, %s7042_s15   ;;  %s5980_s14 = sphi %s6024_s14, %s7041_s14   ;;  %s5976_s13 = sphi %s6022_s13, %s7040_s13   ;;  %s5972_s12 = sphi %s6020_s12, %s7039_s12  }
   0x7   : > { %s31_s20 = sadd.s32 1, %s5988_s16  ;;  %s38_s21 = sadd.s32 1, %s5980_s14 }
   0x8   : > { %p33_p0 = scmp.ge.s32.totalorder %s31_s20, 2  ;;  %p45_p1 = scmp.ne.s32.totalorder %s5980_s14, %s5976_s13 }
   0x9   : > { %p46_p2 = scmp.eq.s32.totalorder %s5992_s17, 0  ;;  %p51_p3 = scmp.ne.s32.totalorder %s5976_s13, %s5972_s12 }
   0xa   : > { %s7045_s20 = smov (%p33_p0, %s31_s20), 0  ;;  %p52_p5 = scmp.eq.s32.totalorder %s4379_s18, 0 }
   0xb   : > { %p6061_p4 = por %p46_p2, %p45_p1  ;;  %s35_s23 = ssub.s32 %s5988_s16, %s7045_s20 }
   0xc   : > { %p129_p6 = scmp.eq.s32.totalorder %s4379_s18, 1  ;;  %p36_p7 = scmp.eq.s32.totalorder %s35_s23, 0 }
   0xd   : > { %p6067_p8 = por %p52_p5, %p51_p3  ;;  %p135_p10 = scmp.eq.s32.totalorder %s4380_s19, 1 }
   0xe   : > { %p6071_p9 = por %p129_p6, %p45_p1  ;;  %p5514_p13 = scmp.lt.s32.totalorder %s5992_s17, 2 }
   0xf   : > { %s6076_s26 = scalar_select %p36_p7, %s5980_s14, %s38_s21  }
  0x10   : > { %s7032_s25 = scalar_select %p6071_p9, 1, 0 }
  0x11   : > { %p6078_p11 = por %p135_p10, %p51_p3  ;;  %s155_s28 = sand.u32 1, %s5980_s14  }
  0x12   : > { %s5498_s29 = smul.u32 576, %s155_s28  ;;  %p6088_p0 = pnand %p5514_p13, %p6061_p4 }
  0x13   : > { %s7033_s27 = scalar_select %p6078_p11, 1, 0 }
  0x14   : > { %s5499_s30 = smul.u32 9216, %s5988_s16  ;;  %s159_s8 = scalar_lea.vmem [#allocation3], %s5498_s29 }
  0x15   : > { %s166_s9 = sshll.u32 %s159_s8, 4  ;;  %s6100_s10 = scalar_lea.sflag [#allocation4], %s155_s28  ;;  %s6097_s9 = int_to_ptr.vmem [resolvable:$true] %s166_s9 }
  0x16   : > { %s6095_s7 = scalar_lea.hbm %s7025_s0, %s5499_s30  ;;  %p5882_p3 = pneg %p6088_p0 }
  0x17   : > { %s5880_s11 = scalar_lea.hbm %s6095_s7, 9216  ;;  %s5885_s21 = scalar_lea.hbm %s7025_s0, 18432 }
  0x18   : > { %p5881_p2 = scmp.ne.s32.totalorder %s6095_s7, %s5880_s11  ;;  %p5886_p6 = scmp.lt.u32.totalorder %s6095_s7, %s7025_s0 }
  0x19   : > { %p5887_p7 = scmp.lt.u32.totalorder %s5885_s21, %s5880_s11  ;;  %p5889_p13 = scmp.lt.u32.totalorder %s5880_s11, %s6095_s7 }
  0x1a   : > { %p5883_p4 = pnand %p5882_p3, %p5881_p2 }
  0x1b   : > { %p5888_p10 = por %p5887_p7, %p5886_p6 }
  0x1c   : > { %p5884_p5 = pneg %p5883_p4 }
  0x1d   : > { %p5890_p12 = por %p5889_p13, %p5888_p10 }
  0x1f   : > { %p5891_p1 = pnand %p5890_p12, %p5884_p5 }
  0x21   : > { %5894 = shalt.err (!%p5891_p1)
}
  0x22   : > { %s5895_s28 = scalar_lea.vmem %s6097_s9, 9216  ;;  %s5994_s29 = smov [#allocation3]  }
  0x23   : > { %p5896_p2 = scmp.ne.s32.totalorder %s6097_s9, %s5895_s28  ;;  %s5900_s30 = sshll.u32 %s5994_s29, 4  ;;  %s5901_s30 = int_to_ptr.vmem [resolvable:$false] %s5900_s30 }
  0x24   : > { %s5902_s5 = scalar_lea.vmem %s5901_s30, 18432  ;;  %p5903_p9 = scmp.lt.s32.totalorder %s6097_s9, %s5901_s30 }
  0x25   : > { %p5898_p4 = pnand %p5896_p2, %p5882_p3  ;;  %p5904_p6 = scmp.lt.s32.totalorder %s5902_s5, %s5895_s28 }
  0x27   : > { %p5899_p11 = pneg %p5898_p4  ;;  %p5905_p7 = por %p5904_p6, %p5903_p9 }
  0x29   : > { %p5906_p10 = pnand %p5905_p7, %p5899_p11 }
  0x2b   : > { %5909 = shalt.err (!%p5906_p10)
}
  0x2c   : > { %s5995_s6 = smov 64   ;;  %s5996_s8 = smov 4  }
  0x2d   : > { %5509 = dma.hbm_to_vmem [thread:$0]  (!%p6088_p0), %s6095_s7, 9216, %s6097_s9, %s6100_s10, %s5995_s6, %s5995_s6, %s5996_s8  }
  0x2e   : > { %p188_p12 = scmp.lt.s32.totalorder %s5992_s17, 3  ;;  %p7035_p1 = scmp.ge.s32.totalorder %s5992_s17, 1 }
  0x30   : > { %p189_p3 = pnand %p7035_p1, %p188_p12 }
  0x31   : > { %s6132_s11 = sand.u32 (!%p189_p3), 1, %s5976_s13  }
  0x32   : > { %192 = sbr.rel (%p189_p3) target bundleno = 614 (0x266), region = 32  ;;  %s195_s19 = scalar_lea.sflag (!%p189_p3), [#allocation4], %s6132_s11 }
  0x33   : > { %s5500_s18 = smul.u32 (!%p189_p3), 576, %s6132_s11 }
  0x35   : > { %s6136_s21 = scalar_lea.vmem (!%p189_p3), [#allocation3], %s5500_s18 }
  0x39   : > { %5963 = dma.done.wait (%p6067_p8), %s195_s19, 9216  }
  0x3a   : > { %5965 = vsyncadd (%p6067_p8), %s195_s19, 4294958080  ;;  %v5568_v0 = vld [vmem:[%s6136_s21 + $0x40] sm:$0xff]   ;;  %v5570_v2 = vld [vmem:[%s6136_s21 + $0x48] sm:$0xff]   ;;  %p229_p9 = scmp.lt.s32.totalorder %s5984_s15, 1  ;;  %vm562_vm0 = vsmask.f32 7424 }
  0x3b   : > { %v5569_v1 = vld [vmem:[%s6136_s21] sm:$0xff]   ;;  %4962 = vmatprep.subr.bf16.mxu0 %v5568_v0  ;;  %5482 = vmatprep.subr.bf16.mxu1 %v5568_v0  ;;  %v5571_v3 = vld [vmem:[%s6136_s21 + $0x8] sm:$0xff]   ;;  %v5572_v4 = vld [vmem:[%s6136_s21 + $0x50] sm:$0xff]   ;;  %vm963_vm1 = vcmask 1046528   ;;  %s4385_s29 = sshll.u32 %s6132_s11, 8  ;;  %s4961_s5 = sshll.u32 %s5984_s15, 12 }
  0x3c   : > { %4963 = vmatpush3.bf16.msra.mxu0 %v5569_v1  ;;  %5490 = vmatpush3.bf16.msra.mxu1 %v5569_v1  ;;  %s6149_s24 = scalar_select %p229_p9, %s5984_s15, 1  ;;  %v5573_v5 = vld [vmem:[%s6136_s21 + $0x10] sm:$0xff]   ;;  %v5574_v6 = vld [vmem:[%s6136_s21 + $0x58] sm:$0xff]   ;;  %v5576_v8 = vld [vmem:[%s6136_s21 + $0x60] sm:$0xff]  }
  0x3d   : > { %4964 = vmatprep.subr.bf16.mxu0 %v5570_v2  ;;  %5483 = vmatprep.subr.bf16.mxu1 %v5570_v2  ;;  %v5575_v7 = vld [vmem:[%s6136_s21 + $0x18] sm:$0xff]   ;;  %v5577_v9 = vld [vmem:[%s6136_s21 + $0x20] sm:$0xff]   ;;  %v5578_v10 = vld [vmem:[%s6136_s21 + $0x68] sm:$0xff]   ;;  %s6865_s30 = scalar_lea.vmem [#allocation6], %s4385_s29  ;;  %s6970_s19 = scalar_lea.hbm %s7028_s3, %s4961_s5 }
  0x3e   : > { %s5501_s4 = smul.u32 216, %s6149_s24  ;;  %v5579_v11 = vld [vmem:[%s6136_s21 + $0x28] sm:$0xff]   ;;  %v5580_v14 = vld [vmem:[%s6136_s21 + $0x70] sm:$0xff]   ;;  %v5582_v29 = vld [vmem:[%s6136_s21 + $0x78] sm:$0xff]   ;;  %s231_s28 = scalar_lea.vmem %s7026_s1, %s6149_s24 }
  0x3f   : > { %v5581_v26 = vld [vmem:[%s6136_s21 + $0x30] sm:$0xff]   ;;  %v5583_v32 = vld [vmem:[%s6136_s21 + $0x38] sm:$0xff]   ;;  %v5590_v34 = vld [vmem:[%s6136_s21 + $0xc0] sm:$0xff]   ;;  %s4264_s6 = sshll.u32 %s6865_s30, 4  ;;  %s4249_s15 = scalar_lea.sflag [#allocation5], %s6132_s11  ;;  %s6972_s6 = int_to_ptr.vmem [resolvable:$true] %s4264_s6 }
  0x40   : > { %4965 = vmatpush3.bf16.msra.mxu0 %v5571_v3  ;;  %5491 = vmatpush3.bf16.msra.mxu1 %v5571_v3  ;;  %s6160_s10 = scalar_lea.vmem %s7027_s2, %s5501_s4  ;;  %v5593_v37 = vld [vmem:[%s6136_s21 + $0x140] sm:$0xff]   ;;  %v5592_v41 = vld [vmem:[%s6136_s21 + $0xc8] sm:$0xff]   ;;  %v5602_v59 = vld [vmem:[%s6136_s21 + $0xd0] sm:$0xff]   ;;  %p7036_p11 = scmp.ne.s32.totalorder %s7032_s25, 0 }
  0x41   : > { %4966 = vmatprep.subr.bf16.mxu0 %v5572_v4  ;;  %5484 = vmatprep.subr.bf16.mxu1 %v5572_v4  ;;  %v5584_v12 = vld [vmem:[%s6160_s10] sm:$0xff]   ;;  %v5585_v13 = vld [vmem:[%s6160_s10 + $0x8] ss:$0 sps:$4 sm:$0x11]   ;;  %v5586_v15 = vld [vmem:[%s6160_s10 + $0x90] sm:$0xff]   ;;  %s5997_s24 = smov [#allocation6]  }
  0x42   : > { %v564_v16 = vshrl.u32 %v5584_v12, 16  ;;  %v566_v17 = vshll.u32 %v5584_v12, 16  ;;  %v571_v18 = vshll.u32 %v5585_v13, 16  ;;  %v5587_v19 = vld [vmem:[%s6160_s10 + $0x98] ss:$0 sps:$4 sm:$0x11]  }
  0x43   : > { %v708_v20 = vshrl.u32 %v5586_v15, 16  ;;  %v710_v21 = vshll.u32 %v5586_v15, 16  ;;  %v715_v24 = vshll.u32 %v5587_v19, 16  ;;  %v5588_v35 = vld [vmem:[%s6160_s10] sm:$0xff]   ;;  %v5589_v36 = vld [vmem:[%s6160_s10 + $0x90] sm:$0xff]   ;;  %v5594_v51 = vld [vmem:[%s6136_s21 + $0x88] sm:$0xff]  }
  0x44   : > { %4967 = vmatpush3.bf16.msra.mxu0 %v5573_v5  ;;  %5492 = vmatpush3.bf16.msra.mxu1 %v5573_v5  ;;  %v568_v22 = vrot.slane %v566_v17, 1  ;;  %v573_v23 = vrot.slane %v571_v18, 1  ;;  %v5591_v38 = vld [vmem:[%s6136_s21 + $0x80] sm:$0xff]   ;;  %v5596_v40 = vld [vmem:[%s6160_s10 + $0xc] sm:$0xff]   ;;  %v5604_v0 = vld [vmem:[%s6136_s21 + $0xd8] sm:$0xff]   ;;  %s5914_s4 = sshll.u32 %s5997_s24, 4  ;;  %s5915_s4 = int_to_ptr.vmem [resolvable:$false] %s5914_s4 }
  0x45   : > { %4968 = vmatprep.subr.bf16.mxu0 %v5574_v6  ;;  %5485 = vmatprep.subr.bf16.mxu1 %v5574_v6  ;;  %v712_v25 = vrot.slane %v710_v21, 1  ;;  %v717_v28 = vrot.slane %v715_v24, 1  ;;  %v5595_v39 = vld [vmem:[%s6136_s21 + $0x100] sm:$0xff]   ;;  %v5597_v42 = vld [vmem:[%s6160_s10 + $0x14] ss:$0 sps:$4 sm:$0x11]   ;;  %p5917_p13 = scmp.lt.s32.totalorder %s6972_s6, %s5915_s4 }
  0x46   : > { %v569_v27 = vor.u32 %v568_v22, %v564_v16  ;;  %v5598_v43 = vld [vmem:[%s6160_s10 + $0x9c] sm:$0xff]   ;;  %v576_v44 = vshrl.u32 %v5596_v40, 16  ;;  %v578_v45 = vshll.u32 %v5596_v40, 16  ;;  %v583_v46 = vshll.u32 %v5597_v42, 16  ;;  %v5600_v58 = vld [vmem:[%s6160_s10 + $0xc] sm:$0xff]   ;;  %v5623_v42 = vld [vmem:[%s6160_s10 + $0xb4] sm:$0xff]  }
  0x47   : > { %v713_v30 = vor.u32 %v712_v25, %v708_v20  ;;  %v5599_v47 = vld [vmem:[%s6160_s10 + $0xa4] ss:$0 sps:$4 sm:$0x11]   ;;  %v720_v48 = vshrl.u32 %v5598_v43, 16  ;;  %v722_v49 = vshll.u32 %v5598_v43, 16  ;;  %v5601_v61 = vld [vmem:[%s6160_s10 + $0x9c] sm:$0xff]  }
  0x48   : > { %4969 = vmatpush3.bf16.msra.mxu0 %v5575_v7  ;;  %5493 = vmatpush3.bf16.msra.mxu1 %v5575_v7  ;;  %v574_v31 = vsel %vm562_vm0, %v569_v27, %v573_v23  ;;  %v580_v50 = vrot.slane %v578_v45, 1  ;;  %v585_v52 = vrot.slane %v583_v46, 1  ;;  %v727_v54 = vshll.u32 %v5599_v47, 16  ;;  %v5603_v63 = vld [vmem:[%s6136_s21 + $0x90] sm:$0xff]   ;;  %v5606_v1 = vld [vmem:[%s6160_s10 + $0x18] sm:$0xff]   ;;  %v5608_v6 = vld [vmem:[%s6160_s10 + $0xa8] sm:$0xff]  }
  0x49   : > { %4970 = vmatprep.subr.bf16.mxu0 %v5576_v8  ;;  %5486 = vmatprep.subr.bf16.mxu1 %v5576_v8  ;;  %v718_v33 = vsel %vm562_vm0, %v713_v30, %v717_v28  ;;  %v724_v53 = vrot.slane %v722_v49, 1  ;;  %v5607_v2 = vld [vmem:[%s6160_s10 + $0x20] ss:$0 sps:$4 sm:$0x11]   ;;  %v588_v3 = vshrl.u32 %v5606_v1, 16  ;;  %v590_v4 = vshll.u32 %v5606_v1, 16 }
  0x4a   : > { %3404 = vmatprep.mubr.bf16.mxu0 %v574_v31  ;;  %3500 = vmatprep.mubr.bf16.mxu1 %v718_v33  ;;  %v581_v55 = vor.u32 %v580_v50, %v576_v44  ;;  %v729_v57 = vrot.slane %v727_v54, 1  ;;  %v595_v5 = vshll.u32 %v5607_v2, 16  ;;  %v5605_v7 = vld [vmem:[%s6136_s21 + $0x98] sm:$0xff]   ;;  %v5609_v8 = vld [vmem:[%s6160_s10 + $0xb0] ss:$0 sps:$4 sm:$0x11]  }
  0x4b   : > { %v725_v56 = vor.u32 %v724_v53, %v720_v48  ;;  %v734_v12 = vshll.u32 %v5608_v6, 16  ;;  %v739_v13 = vshll.u32 %v5609_v8, 16  ;;  %v5611_v17 = vld [vmem:[%s6160_s10 + $0xa8] sm:$0xff]   ;;  %v5612_v18 = vld [vmem:[%s6136_s21 + $0xe0] sm:$0xff]   ;;  %v5620_v30 = vld [vmem:[%s6160_s10 + $0xb4] sm:$0xff]   ;;  %s5916_s7 = scalar_lea.vmem %s5915_s4, 8192 }
  0x4c   : > { %4971 = vmatpush3.bf16.msra.mxu0 %v5577_v9  ;;  %5494 = vmatpush3.bf16.msra.mxu1 %v5577_v9  ;;  %v586_v60 = vsel %vm562_vm0, %v581_v55, %v585_v52  ;;  %v592_v9 = vrot.slane %v590_v4, 1  ;;  %v5613_v20 = vld [vmem:[%s6136_s21 + $0x148] sm:$0xff]   ;;  %v5614_v23 = vld [vmem:[%s6136_s21 + $0xa0] sm:$0xff]   ;;  %v5624_v46 = vld [vmem:[%s6136_s21 + $0xf0] sm:$0xff]  }
  0x4d   : > { %4972 = vmatprep.subr.bf16.mxu0 %v5578_v10  ;;  %5487 = vmatprep.subr.bf16.mxu1 %v5578_v10  ;;  %v730_v62 = vsel %vm562_vm0, %v725_v56, %v729_v57  ;;  %v597_v10 = vrot.slane %v595_v5, 1  ;;  %v736_v16 = vrot.slane %v734_v12, 1  ;;  %v741_v19 = vrot.slane %v739_v13, 1  ;;  %v5615_v24 = vld [vmem:[%s6136_s21 + $0x108] sm:$0xff]   ;;  %v5625_v48 = vld [vmem:[%s6136_s21 + $0xb0] sm:$0xff]   ;;  %v5626_v50 = vld [vmem:[%s6136_s21 + $0xf8] sm:$0xff]  }
  0x4e   : > { %v593_v15 = vor.u32 %v592_v9, %v588_v3  ;;  %v5617_v27 = vld [vmem:[%s6136_s21 + $0xa8] sm:$0xff]   ;;  %v5628_v52 = vld [vmem:[%s6136_s21 + $0xb8] sm:$0xff]   ;;  %v5629_v53 = vld [vmem:[%s6136_s21 + $0x110] sm:$0xff]  }
  0x4f   : > { %v5618_v28 = vld [vmem:[%s6160_s10 + $0x24] sm:$0xff]   ;;  %v5630_v54 = vld [vmem:[%s6160_s10 + $0x30] sm:$0xff]   ;;  %v5631_v55 = vld [vmem:[%s6160_s10 + $0x38] ss:$0 sps:$4 sm:$0x11]  }
  0x50   : > { %4973 = vmatpush3.bf16.msra.mxu0 %v5579_v11  ;;  %5495 = vmatpush3.bf16.msra.mxu1 %v5579_v11  ;;  %v732_v11 = vshrl.u32 %v5608_v6, 16  ;;  %v598_v21 = vsel %vm562_vm0, %v593_v15, %v597_v10  ;;  %v600_v31 = vshrl.u32 %v5618_v28, 16  ;;  %v5632_v56 = vld [vmem:[%s6160_s10 + $0xc] sm:$0xff]   ;;  %v612_v57 = vshrl.u32 %v5630_v54, 16  ;;  %v5636_v1 = vld [vmem:[%s6136_s21 + $0x1c0] sm:$0xff]   ;;  %v5640_v12 = vld [vmem:[%s6160_s10 + $0x18] sm:$0xff]  }
  0x51   : > { %4974 = vmatprep.subr.bf16.mxu0 %v5580_v14  ;;  %5488 = vmatprep.subr.bf16.mxu1 %v5580_v14  ;;  %v5610_v14 = vld [vmem:[%s6160_s10 + $0x18] sm:$0xff]   ;;  %v5637_v4 = vld [vmem:[%s6136_s21 + $0x180] sm:$0xff]  }
  0x52   : > { %v737_v22 = vor.u32 %v736_v16, %v732_v11  ;;  %v5638_v6 = vld [vmem:[%s6160_s10 + $0x3c] sm:$0xff]   ;;  %v5639_v9 = vld [vmem:[%s6160_s10 + $0x44] ss:$0 sps:$4 sm:$0x11]  }
  0x53   : > { %v624_v10 = vshrl.u32 %v5638_v6, 16  ;;  %v626_v11 = vshll.u32 %v5638_v6, 16  ;;  %v5644_v15 = vld [vmem:[%s6136_s21 + $0x158] sm:$0xff]  }
  0x54   : > { %4975 = vmatpush3.bf16.msra.mxu0 %v5581_v26  ;;  %5496 = vmatpush3.bf16.msra.mxu1 %v5581_v26  ;;  %v742_v25 = vsel %vm562_vm0, %v737_v22, %v741_v19  ;;  %v5616_v26 = vld [vmem:[%s6136_s21 + $0xe8] sm:$0xff]   ;;  %v5641_v16 = vld [vmem:[%s6160_s10 + $0x3c] sm:$0xff]  }
  0x55   : > { %4976 = vmatprep.subr.bf16.mxu0 %v5582_v29  ;;  %5489 = vmatprep.subr.bf16.mxu1 %v5582_v29  ;;  %v5619_v29 = vld [vmem:[%s6160_s10 + $0x2c] ss:$0 sps:$4 sm:$0x11]   ;;  %v628_v13 = vrot.slane %v626_v11, 1  ;;  %v5645_v22 = vld [vmem:[%s6136_s21 + $0x118] sm:$0xff]  }
  0x56   : > { %v607_v33 = vshll.u32 %v5619_v29, 16 }
  0x58   : > { %4977 = vmatpush3.bf16.msra.mxu0 %v5583_v32  ;;  %5497 = vmatpush3.bf16.msra.mxu1 %v5583_v32  ;;  %v602_v32 = vshll.u32 %v5618_v28, 16 }
  0x59   : > { %5074 = vmatprep.subr.bf16.mxu1 %v5590_v34  ;;  %5186 = vmatprep.subr.bf16.mxu0 %v5593_v37  ;;  %v5621_v34 = vld [vmem:[%s6160_s10 + $0xbc] ss:$0 sps:$4 sm:$0x11]  }
  0x5a   : > { %v604_v37 = vrot.slane %v602_v32, 1 }
  0x5b   : > { %3405 = vmatmul.mubr.bf16.vlgmr.msra.gmra.mrb[0].mxu0 %v5588_v35  ;;  %3501 = vmatmul.mubr.bf16.vlgmr.msra.gmra.mrb[0].mxu1 %v5589_v36  ;;  %v744_v35 = vshrl.u32 %v5620_v30, 16  ;;  %v746_v36 = vshll.u32 %v5620_v30, 16  ;;  %v5648_v30 = vld [vmem:[%s6160_s10 + $0x24] sm:$0xff]  }
  0x5c   : > { %5075 = vmatpush3.bf16.msra.mxu1 %v5591_v38  ;;  %5187 = vmatpush3.bf16.msra.mxu0 %v5595_v39  ;;  %v5622_v38 = vld [vmem:[%s6160_s10 + $0x24] sm:$0xff]   ;;  %v609_v39 = vrot.slane %v607_v33, 1  ;;  %v605_v43 = vor.u32 %v604_v37, %v600_v31 }
  0x5d   : > { %5076 = vmatprep.subr.bf16.mxu1 %v5592_v41  ;;  %3412 = vmatprep.mubr.bf16.mxu0 %v586_v60  ;;  %v748_v40 = vrot.slane %v746_v36, 1  ;;  %v751_v41 = vshll.u32 %v5621_v34, 16  ;;  %v5652_v33 = vld [vmem:[%s6136_s21 + $0x1c8] sm:$0xff]  }
  0x5e   : > { %3508 = vmatprep.mubr.bf16.mxu1 %v730_v62  ;;  %5188 = vmatprep.subr.bf16.mxu0 %v5613_v20  ;;  %v610_v47 = vsel %vm562_vm0, %v605_v43, %v609_v39  ;;  %v5633_v62 = vld [vmem:[%s6160_s10 + $0x30] sm:$0xff]   ;;  %v5649_v34 = vld [vmem:[%s6160_s10 + $0x48] sm:$0xff]   ;;  %v5654_v43 = vld [vmem:[%s6136_s21 + $0x160] sm:$0xff]  }
  0x5f   : > { %v749_v44 = vor.u32 %v748_v40, %v744_v35  ;;  %v753_v45 = vrot.slane %v751_v41, 1  ;;  %v5643_v20 = vld [vmem:[%s6160_s10 + $0x14] ss:$0 sps:$4 sm:$0x11]   ;;  %v5650_v35 = vld [vmem:[%s6160_s10 + $0x18] sm:$0xfe]  }
  0x60   : > { %5077 = vmatpush3.bf16.msra.mxu1 %v5594_v51  ;;  %5189 = vmatpush3.bf16.msra.mxu0 %v5615_v24  ;;  %v5627_v51 = vld [vmem:[%s6136_s21 + $0x150] sm:$0xff]   ;;  %v968_v24 = vrot.slane %v5643_v20, 1  ;;  %v970_v39 = vrot.slane %v5650_v35, 1  ;;  %v5653_v40 = vld [vmem:[%s6136_s21 + $0x188] sm:$0xff]  }
  0x61   : > { %5078 = vmatprep.subr.bf16.mxu1 %v5602_v59  ;;  %v754_v49 = vsel %vm562_vm0, %v749_v44, %v753_v45  ;;  %5190 = vmatprep.subr.bf16.mxu0 %v5627_v51  ;;  %v619_v59 = vshll.u32 %v5631_v55, 16  ;;  %v5655_v45 = vld [vmem:[%s6136_s21 + $0x120] sm:$0xff]   ;;  %v5674_v20 = vld [vmem:[%s6160_s10 + $0x48] sm:$0xff]  }
  0x62   : > { %v5660_v55 = vld [vmem:[%s6160_s10 + $0x24] sm:$0xfe]  }
  0x63   : > { %3413 = vmatmul.mubr.bf16.gmra.mrb[4].mxu0 %v5600_v58  ;;  %3509 = vmatmul.mubr.bf16.gmra.mrb[4].mxu1 %v5601_v61  ;;  %v614_v58 = vshll.u32 %v5630_v54, 16  ;;  %v621_v61 = vrot.slane %v619_v59, 1  ;;  %v5659_v54 = vld [vmem:[%s6160_s10 + $0x54] sm:$0xff]   ;;  %v973_v59 = vrot.slane %v5660_v55, 1 }
  0x64   : > { %5079 = vmatpush3.bf16.msra.mxu1 %v5603_v63  ;;  %3420 = vmatprep.mubr.bf16.mxu0 %v598_v21  ;;  %v5634_v63 = vld [vmem:[%s6160_s10] sm:$0xfe]   ;;  %v5689_v55 = vld [vmem:[%s6160_s10 + $0x8c] ss:$0 sps:$4 sm:$0x11]  }
  0x65   : > { %5080 = vmatprep.subr.bf16.mxu1 %v5604_v0  ;;  %3516 = vmatprep.mubr.bf16.mxu1 %v742_v25  ;;  %v616_v60 = vrot.slane %v614_v58, 1  ;;  %v5635_v0 = vld [vmem:[%s6160_s10 + $0x8] ss:$0 sps:$4 sm:$0x11]   ;;  %v964_v3 = vrot.slane %v5634_v63, 1 }
  0x66   : > { %5191 = vmatpush3.bf16.msra.mxu0 %v5629_v53  ;;  %v965_v5 = vrot.slane %v5635_v0, 1  ;;  %v5646_v25 = vld [vmem:[%s6160_s10 + $0x48] sm:$0xff]  }
  0x67   : > { %v617_v2 = vor.u32 %v616_v60, %v612_v57  ;;  %5192 = vmatprep.subr.bf16.mxu0 %v5644_v15  ;;  %v636_v28 = vshrl.u32 %v5646_v25, 16  ;;  %v638_v29 = vshll.u32 %v5646_v25, 16  ;;  %v5662_v57 = vld [vmem:[%s6160_s10 + $0x60] sm:$0xff]   ;;  %v5670_v15 = vld [vmem:[%s6136_s21 + $0x128] sm:$0xff]  }
  0x68   : > { %5081 = vmatpush3.bf16.msra.mxu1 %v5605_v7  ;;  %v966_v8 = vsel %vm963_vm1, %v964_v3, %v965_v5  ;;  %v5664_v60 = vld [vmem:[%s6160_s10 + $0x3c] sm:$0xff]   ;;  %v660_v63 = vshrl.u32 %v5662_v57, 16  ;;  %v662_v0 = vshll.u32 %v5662_v57, 16  ;;  %v5668_v5 = vld [vmem:[%s6136_s21 + $0x168] sm:$0xff]  }
  0x69   : > { %5082 = vmatprep.subr.bf16.mxu1 %v5612_v18  ;;  %v622_v7 = vsel %vm562_vm0, %v617_v2, %v621_v61  ;;  %v629_v18 = vor.u32 %v628_v13, %v624_v10  ;;  %v640_v31 = vrot.slane %v638_v29, 1  ;;  %v5665_v10 = vld [vmem:[%s6160_s10 + $0x60] sm:$0xff]   ;;  %v5675_v25 = vld [vmem:[%s6160_s10 + $0x6c] sm:$0xff]  }
  0x6a   : > { %5193 = vmatpush3.bf16.msra.mxu0 %v5645_v22  ;;  %v664_v3 = vrot.slane %v662_v0, 1  ;;  %v5677_v29 = vld [vmem:[%s6160_s10 + $0x44] ss:$0 sps:$4 sm:$0x11]  }
  0x6b   : > { %3421 = vmatmul.mubr.bf16.gmra.mrb[8].mxu0 %v5610_v14  ;;  %3517 = vmatmul.mubr.bf16.gmra.mrb[8].mxu1 %v5611_v17  ;;  %v631_v14 = vshll.u32 %v5639_v9, 16  ;;  %v5642_v17 = vld [vmem:[%s6160_s10 + $0xc] sm:$0xfe]   ;;  %v641_v36 = vor.u32 %v640_v31, %v636_v28  ;;  %v5667_v9 = vld [vmem:[%s6160_s10 + $0x38] ss:$0 sps:$4 sm:$0x11]  }
  0x6c   : > { %5083 = vmatpush3.bf16.msra.mxu1 %v5614_v23  ;;  %3428 = vmatprep.mubr.bf16.mxu0 %v610_v47  ;;  %v967_v21 = vrot.slane %v5642_v17, 1  ;;  %v5657_v47 = vld [vmem:[%s6160_s10 + $0x5c] ss:$0 sps:$4 sm:$0x11]   ;;  %v665_v6 = vor.u32 %v664_v3, %v660_v63  ;;  %v977_v13 = vrot.slane %v5667_v9, 1  ;;  %v5671_v17 = vld [vmem:[%s6136_s21 + $0x190] sm:$0xff]  }
  0x6d   : > { %5084 = vmatprep.subr.bf16.mxu1 %v5616_v26  ;;  %3524 = vmatprep.mubr.bf16.mxu1 %v754_v49  ;;  %v633_v19 = vrot.slane %v631_v14, 1  ;;  %v655_v51 = vshll.u32 %v5657_v47, 16  ;;  %v5669_v14 = vld [vmem:[%s6136_s21 + $0x1d0] sm:$0xff]   ;;  %v5676_v28 = vld [vmem:[%s6160_s10 + $0x3c] sm:$0xfe]  }
  0x6e   : > { %v969_v26 = vsel %vm963_vm1, %v967_v21, %v968_v24  ;;  %5194 = vmatprep.subr.bf16.mxu0 %v5654_v43  ;;  %v979_v31 = vrot.slane %v5676_v28, 1  ;;  %v5686_v43 = vld [vmem:[%s6136_s21 + $0x1d8] sm:$0xff]   ;;  %v5684_v47 = vld [vmem:[%s6160_s10 + $0x48] sm:$0xfe]  }
  0x6f   : > { %v634_v23 = vsel %vm562_vm0, %v629_v18, %v633_v19  ;;  %5195 = vmatpush3.bf16.msra.mxu0 %v5655_v45  ;;  %v657_v53 = vrot.slane %v655_v51, 1  ;;  %v5672_v18 = vld [vmem:[%s6160_s10 + $0x6c] sm:$0xff]   ;;  %v5673_v19 = vld [vmem:[%s6160_s10 + $0x74] ss:$0 sps:$4 sm:$0x11]   ;;  %v5706_v28 = vld [vmem:[%s6160_s10 + $0x78] sm:$0xff]  }
  0x70   : > { %5085 = vmatpush3.bf16.msra.mxu1 %v5617_v27  ;;  %v5647_v27 = vld [vmem:[%s6160_s10 + $0x50] ss:$0 sps:$4 sm:$0x11]   ;;  %5196 = vmatprep.subr.bf16.mxu0 %v5668_v5  ;;  %v672_v21 = vshrl.u32 %v5672_v18, 16  ;;  %v674_v22 = vshll.u32 %v5672_v18, 16 }
  0x71   : > { %5086 = vmatprep.subr.bf16.mxu1 %v5624_v46  ;;  %v643_v32 = vshll.u32 %v5647_v27, 16  ;;  %v5656_v46 = vld [vmem:[%s6160_s10 + $0x54] sm:$0xff]   ;;  %v5697_v9 = vld [vmem:[%s6160_s10 + $0xc] sm:$0xfe]  }
  0x72   : > { %v648_v49 = vshrl.u32 %v5656_v46, 16  ;;  %v676_v24 = vrot.slane %v674_v22, 1 }
  0x73   : > { %3429 = vmatmul.mubr.bf16.gmra.mrb[12].mxu0 %v5622_v38  ;;  %3525 = vmatmul.mubr.bf16.gmra.mrb[12].mxu1 %v5623_v42  ;;  %v645_v37 = vrot.slane %v643_v32, 1  ;;  %v5651_v38 = vld [vmem:[%s6160_s10 + $0x20] ss:$0 sps:$4 sm:$0x11]   ;;  %v980_v32 = vrot.slane %v5677_v29, 1 }
  0x74   : > { %5087 = vmatpush3.bf16.msra.mxu1 %v5625_v48  ;;  %3565 = vmatprep.mubr.bf16.mxu1 %v5632_v56  ;;  %v971_v42 = vrot.slane %v5651_v38, 1  ;;  %v5658_v48 = vld [vmem:[%s6160_s10 + $0x30] sm:$0xff]   ;;  %v5661_v56 = vld [vmem:[%s6160_s10 + $0x2c] ss:$0 sps:$4 sm:$0x11]  }
  0x75   : > { %5088 = vmatprep.subr.bf16.mxu1 %v5626_v50  ;;  %3436 = vmatprep.mubr.bf16.mxu0 %v622_v7  ;;  %v646_v41 = vsel %vm562_vm0, %v641_v36, %v645_v37  ;;  %v650_v50 = vshll.u32 %v5656_v46, 16  ;;  %v974_v61 = vrot.slane %v5661_v56, 1  ;;  %v981_v36 = vsel %vm963_vm1, %v979_v31, %v980_v32  ;;  %v5681_v37 = vld [vmem:[%s6160_s10 + $0x80] ss:$0 sps:$4 sm:$0x11]  }
  0x76   : > { %v972_v44 = vsel %vm963_vm1, %v970_v39, %v971_v42  ;;  %5197 = vmatpush3.bf16.msra.mxu0 %v5670_v15  ;;  %v691_v42 = vshll.u32 %v5681_v37, 16  ;;  %v5699_v15 = vld [vmem:[%s6160_s10 + $0x60] sm:$0xfe]   ;;  %v5707_v32 = vld [vmem:[%s6160_s10 + $0x18] sm:$0xfe]  }
  0x77   : > { %v975_v2 = vsel %vm963_vm1, %v973_v59, %v974_v61  ;;  %v5694_v61 = vld [vmem:[%s6136_s21 + $0x178] sm:$0xff]   ;;  %v988_v18 = vrot.slane %v5699_v15, 1 }
  0x78   : > { %5089 = vmatpush3.bf16.msra.mxu1 %v5628_v52  ;;  %v652_v52 = vrot.slane %v650_v50, 1  ;;  %v693_v46 = vrot.slane %v691_v42, 1  ;;  %v982_v50 = vrot.slane %v5684_v47, 1  ;;  %v5713_v47 = vld [vmem:[%s6160_s10 + $0x84] sm:$0xff]  }
  0x79   : > { %5298 = vmatprep.subr.bf16.mxu1 %v5636_v1 }
  0x7a   : > { %v653_v58 = vor.u32 %v652_v52, %v648_v49  ;;  %v5687_v52 = vld [vmem:[%s6136_s21 + $0x198] sm:$0xff]  }
  0x7b   : > { %3437 = vmatmul.mubr.bf16.gmra.mrb[16].mxu0 %v5633_v62  ;;  %3566 = vmatmul.mubr.bf16.vlgmr.msra.gmra.mrb[16].mxu1 %v966_v8  ;;  %v5663_v62 = vld [vmem:[%s6160_s10 + $0x68] ss:$0 sps:$4 sm:$0x11]   ;;  %v5666_v8 = vld [vmem:[%s6160_s10 + $0x30] sm:$0xfe]  }
  0x7c   : > { %5299 = vmatpush3.bf16.msra.mxu1 %v5637_v4  ;;  %3573 = vmatprep.mubr.bf16.mxu1 %v5640_v12  ;;  %v658_v1 = vsel %vm562_vm0, %v653_v58, %v657_v53  ;;  %v667_v4 = vshll.u32 %v5663_v62, 16  ;;  %v976_v12 = vrot.slane %v5666_v8, 1  ;;  %v5688_v53 = vld [vmem:[%s6160_s10 + $0x84] sm:$0xff]  }
  0x7d   : > { %3444 = vmatprep.mubr.bf16.mxu0 %v634_v23  ;;  %5300 = vmatprep.subr.bf16.mxu1 %v5652_v33  ;;  %v679_v23 = vshll.u32 %v5673_v19, 16  ;;  %v5679_v33 = vld [vmem:[%s6136_s21 + $0x130] sm:$0xff]   ;;  %v696_v56 = vshrl.u32 %v5688_v53, 16  ;;  %v698_v57 = vshll.u32 %v5688_v53, 16  ;;  %v5690_v58 = vld [vmem:[%s6160_s10 + $0x60] sm:$0xff]  }
  0x7e   : > { %v669_v7 = vrot.slane %v667_v4, 1  ;;  %v5691_v62 = vld [vmem:[%s6160_s10 + $0x84] sm:$0xff]  }
  0x7f   : > { %v681_v27 = vrot.slane %v679_v23, 1  ;;  %v700_v59 = vrot.slane %v698_v57, 1  ;;  %v5704_v23 = vld [vmem:[%s6136_s21 + $0x1a0] sm:$0xff]  }
  0x80   : > { %5301 = vmatpush3.bf16.msra.mxu1 %v5653_v40  ;;  %v670_v11 = vsel %vm562_vm0, %v665_v6, %v669_v7  ;;  %v5682_v40 = vld [vmem:[%s6160_s10 + $0x54] sm:$0xff]   ;;  %v5696_v7 = vld [vmem:[%s6160_s10 + $0x6c] sm:$0xff]  }
  0x81   : > { %5302 = vmatprep.subr.bf16.mxu1 %v5669_v14  ;;  %v701_v63 = vor.u32 %v700_v59, %v696_v56  ;;  %v5695_v6 = vld [vmem:[%s6136_s21 + $0x138] sm:$0xff]  }
  0x83   : > { %3445 = vmatmul.mubr.bf16.gmra.mrb[20].mxu0 %v5641_v16  ;;  %3574 = vmatmul.mubr.bf16.gmra.mrb[20].mxu1 %v969_v26  ;;  %v978_v16 = vsel %vm963_vm1, %v976_v12, %v977_v13  ;;  %v5678_v26 = vld [vmem:[%s6136_s21 + $0x170] sm:$0xff]   ;;  %v1768_v12 = vrot.slane %v5697_v9, 1  ;;  %v5703_v13 = vld [vmem:[%s6136_s21 + $0x1e0] sm:$0xff]  }
  0x84   : > { %3581 = vmatprep.mubr.bf16.mxu1 %v5648_v30  ;;  %3452 = vmatprep.mubr.bf16.mxu0 %v646_v41  ;;  %v677_v30 = vor.u32 %v676_v24, %v672_v21  ;;  %v5723_v9 = vld [vmem:[%s6160_s10 + $0x90] sm:$0xff]  }
  0x85   : > { %5303 = vmatpush3.bf16.msra.mxu1 %v5671_v17  ;;  %5198 = vmatprep.subr.bf16.mxu0 %v5678_v26  ;;  %v5705_v26 = vld [vmem:[%s6136_s21 + $0x200] sm:$0xff]  }
  0x86   : > { %v682_v35 = vsel %vm562_vm0, %v677_v30, %v681_v27  ;;  %5199 = vmatpush3.bf16.msra.mxu0 %v5679_v33  ;;  %5304 = vmatprep.subr.bf16.mxu1 %v5686_v43  ;;  %v5711_v30 = vld [vmem:[%s6160_s10 + $0x18] sm:$0xff]   ;;  %v5708_v33 = vld [vmem:[%s6160_s10 + $0x20] ss:$0 sps:$4 sm:$0x11]  }
  0x87   : > { %5200 = vmatprep.subr.bf16.mxu0 %v5694_v61  ;;  %v1772_v37 = vrot.slane %v5708_v33, 1  ;;  %v5712_v43 = vld [vmem:[%s6160_s10 + $0x20] ss:$0 sps:$4 sm:$0x11]  }
  0x88   : > { %v5732_v33 = vld [vmem:[%s6160_s10 + $0x44] ss:$0 sps:$4 sm:$0x11]  }
  0x89   : > { %5305 = vmatpush3.bf16.msra.mxu1 %v5687_v52  ;;  %v5715_v52 = vld [vmem:[%s6160_s10 + $0x2c] ss:$0 sps:$4 sm:$0x11]  }
  0x8a   : > { %5201 = vmatpush3.bf16.msra.mxu0 %v5695_v6  ;;  %5306 = vmatprep.subr.bf16.mxu1 %v5703_v13  ;;  %v1775_v57 = vrot.slane %v5715_v52, 1  ;;  %v5722_v6 = vld [vmem:[%s6136_s21 + $0x208] sm:$0xff]  }
  0x8b   : > { %3453 = vmatmul.mubr.bf16.gmra.mrb[24].mxu0 %v5649_v34  ;;  %3582 = vmatmul.mubr.bf16.gmra.mrb[24].mxu1 %v972_v44  ;;  %v5680_v34 = vld [vmem:[%s6160_s10 + $0x78] sm:$0xff]   ;;  %v5740_v52 = vld [vmem:[%s6160_s10 + $0xa8] sm:$0xff]  }
  0x8c   : > { %3589 = vmatprep.mubr.bf16.mxu1 %v5658_v48  ;;  %3460 = vmatprep.mubr.bf16.mxu0 %v658_v1  ;;  %v684_v38 = vshrl.u32 %v5680_v34, 16  ;;  %v686_v39 = vshll.u32 %v5680_v34, 16  ;;  %v5683_v44 = vld [vmem:[%s6160_s10 + $0x78] sm:$0xff]   ;;  %v5685_v48 = vld [vmem:[%s6160_s10 + $0x50] ss:$0 sps:$4 sm:$0x11]  }
  0x8d   : > { %v983_v51 = vrot.slane %v5685_v48, 1  ;;  %v5692_v1 = vld [vmem:[%s6160_s10 + $0x54] sm:$0xfe]   ;;  %5307 = vmatpush3.bf16.msra.mxu1 %v5704_v23  ;;  %5434 = vmatprep.subr.bf16.mxu0 %v5705_v26  ;;  %v1381_v34 = vshrl.u32 %v5711_v30, 16 }
  0x8e   : > { %v688_v41 = vrot.slane %v686_v39, 1  ;;  %v985_v4 = vrot.slane %v5692_v1, 1  ;;  %v5710_v39 = vld [vmem:[%s6160_s10 + $0x74] ss:$0 sps:$4 sm:$0x11]   ;;  %v5720_v1 = vld [vmem:[%s6136_s21 + $0x1e8] sm:$0xff]  }
  0x8f   : > { %5308 = vmatprep.subr.bf16.mxu1 %v5720_v1  ;;  %v5746_v1 = vld [vmem:[%s6160_s10 + $0x50] ss:$0 sps:$4 sm:$0x11]  }
  0x90   : > { %v689_v45 = vor.u32 %v688_v41, %v684_v38  ;;  %v5709_v38 = vld [vmem:[%s6160_s10 + $0x6c] sm:$0xfe]  }
  0x91   : > { %v991_v42 = vrot.slane %v5709_v38, 1  ;;  %v5733_v38 = vld [vmem:[%s6160_s10 + $0x90] sm:$0xfe]  }
  0x92   : > { %v694_v49 = vsel %vm562_vm0, %v689_v45, %v693_v46  ;;  %v1388_v46 = vshll.u32 %v5712_v43, 16 }
  0x93   : > { %3461 = vmatmul.mubr.bf16.gmra.mrb[28].mxu0 %v5659_v54  ;;  %3590 = vmatmul.mubr.bf16.gmra.mrb[28].mxu1 %v975_v2  ;;  %v984_v54 = vsel %vm963_vm1, %v982_v50, %v983_v51  ;;  %v5693_v2 = vld [vmem:[%s6160_s10 + $0x5c] ss:$0 sps:$4 sm:$0x11]   ;;  %v5714_v50 = vld [vmem:[%s6160_s10 + $0x24] sm:$0xfe]  }
  0x94   : > { %3597 = vmatprep.mubr.bf16.mxu1 %v5664_v60  ;;  %3468 = vmatprep.mubr.bf16.mxu0 %v670_v11  ;;  %v703_v60 = vshll.u32 %v5689_v55, 16  ;;  %v986_v5 = vrot.slane %v5693_v2, 1  ;;  %v5701_v11 = vld [vmem:[%s6160_s10 + $0xc] sm:$0xff]   ;;  %v1390_v51 = vrot.slane %v1388_v46, 1  ;;  %v1774_v53 = vrot.slane %v5714_v50, 1  ;;  %v5718_v55 = vld [vmem:[%s6160_s10 + $0x24] sm:$0xff]  }
  0x95   : > { %v1369_v21 = vshrl.u32 %v5701_v11, 16  ;;  %v1371_v22 = vshll.u32 %v5701_v11, 16  ;;  %v5739_v50 = vld [vmem:[%s6136_s21 + $0x210] sm:$0xff]  }
  0x96   : > { %v705_v0 = vrot.slane %v703_v60, 1  ;;  %v987_v8 = vsel %vm963_vm1, %v985_v4, %v986_v5  ;;  %v1393_v60 = vshrl.u32 %v5718_v55, 16  ;;  %v1776_v61 = vsel %vm963_vm1, %v1774_v53, %v1775_v57  ;;  %v5721_v5 = vld [vmem:[%s6136_s21 + $0x1a8] sm:$0xff]  }
  0x97   : > { %v1373_v27 = vrot.slane %v1371_v22, 1  ;;  %5309 = vmatpush3.bf16.msra.mxu1 %v5721_v5  ;;  %v5729_v22 = vld [vmem:[%s6160_s10 + $0x38] ss:$0 sps:$4 sm:$0x11]   ;;  %v5741_v53 = vld [vmem:[%s6160_s10 + $0x48] sm:$0xfe]  }
  0x98   : > { %v706_v3 = vsel %vm562_vm0, %v701_v63, %v705_v0  ;;  %v5719_v63 = vld [vmem:[%s6160_s10 + $0x2c] ss:$0 sps:$4 sm:$0x11]   ;;  %v1395_v0 = vshll.u32 %v5718_v55, 16 }
  0x99   : > { %v1374_v31 = vor.u32 %v1373_v27, %v1369_v21  ;;  %v1400_v4 = vshll.u32 %v5719_v63, 16  ;;  %v1412_v27 = vshll.u32 %v5729_v22, 16  ;;  %v5742_v55 = vld [vmem:[%s6160_s10 + $0x50] ss:$0 sps:$4 sm:$0x11]   ;;  %v5745_v57 = vld [vmem:[%s6160_s10 + $0x48] sm:$0xff]  }
  0x9b   : > { %3469 = vmatmul.mubr.bf16.gmra.mrb[32].mxu0 %v5665_v10  ;;  %3598 = vmatmul.mubr.bf16.gmra.mrb[32].mxu1 %v978_v16  ;;  %v5698_v10 = vld [vmem:[%s6160_s10 + $0x14] ss:$0 sps:$4 sm:$0x11]   ;;  %v5700_v16 = vld [vmem:[%s6160_s10 + $0x68] ss:$0 sps:$4 sm:$0x11]  }
  0x9c   : > { %3605 = vmatprep.mubr.bf16.mxu1 %v5674_v20  ;;  %3476 = vmatprep.mubr.bf16.mxu0 %v682_v35  ;;  %v1769_v14 = vrot.slane %v5698_v10, 1  ;;  %v989_v19 = vrot.slane %v5700_v16, 1  ;;  %v5702_v20 = vld [vmem:[%s6160_s10 + $0x14] ss:$0 sps:$4 sm:$0x11]  }
  0x9d   : > { %v5724_v10 = vld [vmem:[%s6160_s10 + $0x30] sm:$0xfe]   ;;  %v5726_v16 = vld [vmem:[%s6160_s10 + $0x84] sm:$0xfe]  }
  0x9e   : > { %v1770_v17 = vsel %vm963_vm1, %v1768_v12, %v1769_v14  ;;  %v990_v24 = vsel %vm963_vm1, %v988_v18, %v989_v19  ;;  %v5725_v12 = vld [vmem:[%s6160_s10 + $0x38] ss:$0 sps:$4 sm:$0x11]   ;;  %v1777_v13 = vrot.slane %v5724_v10, 1  ;;  %v5728_v14 = vld [vmem:[%s6160_s10 + $0x30] sm:$0xff]   ;;  %v5730_v18 = vld [vmem:[%s6160_s10 + $0x9c] sm:$0xff]  }
  0x9f   : > { %v1778_v15 = vrot.slane %v5725_v12, 1  ;;  %v1405_v23 = vshrl.u32 %v5728_v14, 16  ;;  %v5749_v12 = vld [vmem:[%s6160_s10 + $0x5c] ss:$0 sps:$4 sm:$0x11]  }
  0xa1   : > { %v1779_v19 = vsel %vm963_vm1, %v1777_v13, %v1778_v15 }
  0xa3   : > { %3477 = vmatmul.mubr.bf16.gmra.mrb[36].mxu0 %v5675_v25  ;;  %3606 = vmatmul.mubr.bf16.gmra.mrb[36].mxu1 %v981_v36  ;;  %v1376_v25 = vshll.u32 %v5702_v20, 16  ;;  %v1771_v36 = vrot.slane %v5707_v32, 1  ;;  %v997_v20 = vrot.slane %v5726_v16, 1  ;;  %v1414_v32 = vrot.slane %v1412_v27, 1 }
  0xa4   : > { %3613 = vmatprep.mubr.bf16.mxu1 %v5682_v40  ;;  %3484 = vmatprep.mubr.bf16.mxu0 %v694_v49  ;;  %v1383_v40 = vshll.u32 %v5711_v30, 16  ;;  %v5731_v30 = vld [vmem:[%s6160_s10 + $0x3c] sm:$0xfe]   ;;  %v1787_v16 = vrot.slane %v5749_v12, 1 }
  0xa5   : > { %v1378_v29 = vrot.slane %v1376_v25, 1  ;;  %v1773_v41 = vsel %vm963_vm1, %v1771_v36, %v1772_v37  ;;  %v5735_v25 = vld [vmem:[%s6160_s10 + $0x3c] sm:$0xff]   ;;  %v1781_v37 = vrot.slane %v5732_v33, 1 }
  0xa6   : > { %v1385_v45 = vrot.slane %v1383_v40, 1  ;;  %v1419_v36 = vshll.u32 %v5735_v25, 16  ;;  %v5772_v12 = vld [vmem:[%s6160_s10 + $0x78] sm:$0xfe]  }
  0xa7   : > { %v1379_v35 = vsel %vm562_vm0, %v1374_v31, %v1378_v29  ;;  %v1417_v31 = vshrl.u32 %v5735_v25, 16 }
  0xa8   : > { %v1386_v49 = vor.u32 %v1385_v45, %v1381_v34  ;;  %v1421_v45 = vrot.slane %v1419_v36, 1 }
  0xaa   : > { %v1391_v56 = vsel %vm562_vm0, %v1386_v49, %v1390_v51  ;;  %v5738_v49 = vld [vmem:[%s6136_s21 + $0x1b0] sm:$0xff]  }
  0xab   : > { %3485 = vmatmul.mubr.bf16.gmra.mrb[40].mxu0 %v5683_v44  ;;  %3614 = vmatmul.mubr.bf16.gmra.mrb[40].mxu1 %v984_v54  ;;  %v992_v44 = vrot.slane %v5710_v39, 1  ;;  %v5716_v54 = vld [vmem:[%s6160_s10 + $0x78] sm:$0xfe]   ;;  %v5734_v39 = vld [vmem:[%s6160_s10 + $0x98] ss:$0 sps:$4 sm:$0x11]  }
  0xac   : > { %3621 = vmatprep.mubr.bf16.mxu1 %v5690_v58  ;;  %3492 = vmatprep.mubr.bf16.mxu0 %v706_v3  ;;  %v5717_v58 = vld [vmem:[%s6160_s10 + $0x80] ss:$0 sps:$4 sm:$0x11]   ;;  %v994_v59 = vrot.slane %v5716_v54, 1  ;;  %v1397_v3 = vrot.slane %v1395_v0, 1  ;;  %v1001_v43 = vrot.slane %v5734_v39, 1 }
  0xad   : > { %v993_v48 = vsel %vm963_vm1, %v991_v42, %v992_v44  ;;  %v1000_v42 = vrot.slane %v5733_v38, 1  ;;  %v5736_v44 = vld [vmem:[%s6160_s10 + $0x44] ss:$0 sps:$4 sm:$0x11]   ;;  %v5760_v39 = vld [vmem:[%s6160_s10 + $0xb4] sm:$0xfe]  }
  0xaf   : > { %v1002_v46 = vsel %vm963_vm1, %v1000_v42, %v1001_v43  ;;  %v1009_v42 = vrot.slane %v5760_v39, 1 }
  0xb3   : > { %3493 = vmatmul.mubr.bf16.gmra.mrb[44].mxu0 %v5691_v62  ;;  %3622 = vmatmul.mubr.bf16.gmra.mrb[44].mxu1 %v987_v8  ;;  %v995_v62 = vrot.slane %v5717_v58, 1  ;;  %v1402_v8 = vrot.slane %v1400_v4, 1  ;;  %v1784_v58 = vrot.slane %v5742_v55, 1  ;;  %v5752_v4 = vld [vmem:[%s6160_s10 + $0x54] sm:$0xff]  }
  0xb4   : > { %3629 = vmatprep.mubr.bf16.mxu1 %v5696_v7  ;;  %3726 = vmatprep.mubr.bf16.mxu0 %v1770_v17  ;;  %v1398_v7 = vor.u32 %v1397_v3, %v1393_v60  ;;  %v5727_v17 = vld [vmem:[%s6160_s10 + $0x8c] ss:$0 sps:$4 sm:$0x11]   ;;  %v5744_v60 = vld [vmem:[%s6160_s10 + $0xa4] ss:$0 sps:$4 sm:$0x11]  }
  0xb5   : > { %v996_v2 = vsel %vm963_vm1, %v994_v59, %v995_v62  ;;  %v998_v21 = vrot.slane %v5727_v17, 1  ;;  %v5743_v59 = vld [vmem:[%s6160_s10 + $0x9c] sm:$0xfe]   ;;  %v1004_v0 = vrot.slane %v5744_v60, 1  ;;  %v1431_v3 = vshll.u32 %v5745_v57, 16  ;;  %v5768_v60 = vld [vmem:[%s6160_s10 + $0x6c] sm:$0xff]  }
  0xb6   : > { %v1403_v11 = vsel %vm562_vm0, %v1398_v7, %v1402_v8  ;;  %v1003_v63 = vrot.slane %v5743_v59, 1  ;;  %v5754_v7 = vld [vmem:[%s6136_s21 + $0x1f8] sm:$0xff]   ;;  %v1441_v10 = vshrl.u32 %v5752_v4, 16  ;;  %v1443_v15 = vshll.u32 %v5752_v4, 16  ;;  %v5750_v17 = vld [vmem:[%s6160_s10 + $0xa8] sm:$0xfe]  }
  0xb7   : > { %v1433_v8 = vrot.slane %v1431_v3, 1  ;;  %v1467_v3 = vshll.u32 %v5768_v60, 16  ;;  %v5770_v4 = vld [vmem:[%s6160_s10 + $0x18] sm:$0xff]  }
  0xb8   : > { %v1005_v5 = vsel %vm963_vm1, %v1003_v63, %v1004_v0 }
  0xbb   : > { %3630 = vmatmul.mubr.bf16.gmra.mrb[48].mxu1 %v990_v24  ;;  %3727 = vmatmul.mubr.bf16.vlgmr.msra.gmra.mrb[48].mxu0 %v1379_v35  ;;  %v1407_v24 = vshll.u32 %v5728_v14, 16  ;;  %v1780_v35 = vrot.slane %v5731_v30, 1 }
  0xbc   : > { %3637 = vmatprep.mubr.bf16.mxu1 %v5706_v28  ;;  %5435 = vmatpush3.bf16.msra.mxu0 %v5705_v26  ;;  %v999_v26 = vsel %vm963_vm1, %v997_v20, %v998_v21  ;;  %v5737_v28 = vld [vmem:[%s6136_s21 + $0x1f0] sm:$0xff]   ;;  %v1006_v21 = vrot.slane %v5750_v17, 1  ;;  %v1795_v17 = vrot.slane %v5772_v12, 1 }
  0xbd   : > { %3734 = vmatprep.mubr.bf16.mxu0 %v1773_v41  ;;  %5436 = vmatprep.subr.bf16.mxu0 %v5722_v6  ;;  %v1409_v29 = vrot.slane %v1407_v24, 1  ;;  %v1782_v41 = vsel %vm963_vm1, %v1780_v35, %v1781_v37  ;;  %v1445_v24 = vrot.slane %v1443_v15, 1  ;;  %v5762_v35 = vld [vmem:[%s6160_s10 + $0x60] sm:$0xff]   ;;  %v5766_v37 = vld [vmem:[%s6160_s10 + $0x18] sm:$0xff]  }
  0xbe   : > { %5310 = vmatprep.subr.bf16.mxu1 %v5737_v28  ;;  %v5755_v28 = vld [vmem:[%s6136_s21 + $0x1b8] sm:$0xff]   ;;  %v5773_v15 = vld [vmem:[%s6160_s10 + $0x80] ss:$0 sps:$4 sm:$0x11]  }
  0xbf   : > { %v1410_v34 = vor.u32 %v1409_v29, %v1405_v23  ;;  %5311 = vmatpush3.bf16.msra.mxu1 %v5738_v49  ;;  %v5753_v23 = vld [vmem:[%s6160_s10 + $0x5c] ss:$0 sps:$4 sm:$0x11]  }
  0xc0   : > { %5437 = vmatpush3.bf16.msra.mxu0 %v5722_v6  ;;  %v1436_v6 = vshll.u32 %v5746_v1, 16  ;;  %5312 = vmatprep.subr.bf16.mxu1 %v5754_v7  ;;  %v1448_v27 = vshll.u32 %v5753_v23, 16  ;;  %v5756_v29 = vld [vmem:[%s6136_s21 + $0x218] sm:$0xff]   ;;  %v5769_v1 = vld [vmem:[%s6160_s10 + $0x74] ss:$0 sps:$4 sm:$0x11]  }
  0xc1   : > { %v1415_v40 = vsel %vm562_vm0, %v1410_v34, %v1414_v32  ;;  %5438 = vmatprep.subr.bf16.mxu0 %v5739_v50  ;;  %v5758_v32 = vld [vmem:[%s6160_s10 + $0x60] sm:$0xfe]   ;;  %v5759_v34 = vld [vmem:[%s6160_s10 + $0x68] ss:$0 sps:$4 sm:$0x11]   ;;  %v1472_v7 = vshll.u32 %v5769_v1, 16 }
  0xc2   : > { %v1450_v30 = vrot.slane %v1448_v27, 1  ;;  %v1789_v36 = vrot.slane %v5758_v32, 1  ;;  %v1790_v38 = vrot.slane %v5759_v34, 1  ;;  %v5779_v34 = vld [vmem:[%s6160_s10 + $0x84] sm:$0xfe]  }
  0xc3   : > { %3638 = vmatmul.mubr.bf16.gmra.mrb[52].mxu1 %v993_v48  ;;  %3735 = vmatmul.mubr.bf16.gmra.mrb[52].mxu0 %v1391_v56  ;;  %v1424_v48 = vshll.u32 %v5736_v44, 16  ;;  %v1783_v56 = vrot.slane %v5741_v53, 1  ;;  %v5763_v44 = vld [vmem:[%s6160_s10 + $0x68] ss:$0 sps:$4 sm:$0x11]   ;;  %v1798_v39 = vrot.slane %v5779_v34, 1 }
  0xc4   : > { %3645 = vmatprep.mubr.bf16.mxu1 %v5713_v47  ;;  %3742 = vmatprep.mubr.bf16.mxu0 %v1776_v61  ;;  %v1422_v47 = vor.u32 %v1421_v45, %v1417_v31  ;;  %v5747_v61 = vld [vmem:[%s6160_s10 + $0xb4] sm:$0xff]   ;;  %v5757_v31 = vld [vmem:[%s6160_s10 + $0xc0] sm:$0xff]   ;;  %v1453_v45 = vshrl.u32 %v5762_v35, 16  ;;  %v1460_v49 = vshll.u32 %v5763_v44, 16 }
  0xc5   : > { %v1426_v51 = vrot.slane %v1424_v48, 1  ;;  %5439 = vmatpush3.bf16.msra.mxu0 %v5739_v50  ;;  %v1785_v62 = vsel %vm963_vm1, %v1783_v56, %v1784_v58  ;;  %5313 = vmatpush3.bf16.msra.mxu1 %v5755_v28  ;;  %v5764_v50 = vld [vmem:[%s6160_s10 + $0x6c] sm:$0xfe]   ;;  %v5765_v53 = vld [vmem:[%s6160_s10 + $0x74] ss:$0 sps:$4 sm:$0x11]  }
  0xc6   : > { %5440 = vmatprep.subr.bf16.mxu0 %v5756_v29  ;;  %v1792_v55 = vrot.slane %v5764_v50, 1  ;;  %v5767_v58 = vld [vmem:[%s6160_s10 + $0x20] ss:$0 sps:$4 sm:$0x11]   ;;  %v5778_v28 = vld [vmem:[%s6160_s10 + $0x24] sm:$0xff]  }
  0xc7   : > { %v1427_v54 = vsel %vm562_vm0, %v1422_v47, %v1426_v51  ;;  %v2173_v47 = vshrl.u32 %v5766_v37, 16  ;;  %v2175_v51 = vshll.u32 %v5766_v37, 16  ;;  %v2180_v0 = vshll.u32 %v5767_v58, 16 }
  0xc9   : > { %5441 = vmatpush3.bf16.msra.mxu0 %v5756_v29  ;;  %v2177_v59 = vrot.slane %v2175_v51, 1 }
  0xcb   : > { %3646 = vmatmul.mubr.bf16.gmra.mrb[56].mxu1 %v996_v2  ;;  %3743 = vmatmul.mubr.bf16.gmra.mrb[56].mxu0 %v1403_v11  ;;  %v1429_v2 = vshrl.u32 %v5745_v57, 16  ;;  %v1438_v11 = vrot.slane %v1436_v6, 1  ;;  %v1793_v57 = vrot.slane %v5765_v53, 1  ;;  %v2178_v63 = vor.u32 %v2177_v59, %v2173_v47 }
  0xcc   : > { %3653 = vmatprep.mubr.bf16.mxu1 %v5723_v9  ;;  %3750 = vmatprep.mubr.bf16.mxu0 %v1779_v19  ;;  %v5748_v9 = vld [vmem:[%s6160_s10 + $0x54] sm:$0xfe]   ;;  %v2182_v6 = vrot.slane %v2180_v0, 1 }
  0xcd   : > { %v1434_v13 = vor.u32 %v1433_v8, %v1429_v2  ;;  %v1786_v14 = vrot.slane %v5748_v9, 1  ;;  %v1465_v2 = vshrl.u32 %v5768_v60, 16  ;;  %v1469_v8 = vrot.slane %v1467_v3, 1  ;;  %v5774_v9 = vld [vmem:[%s6160_s10 + $0x24] sm:$0xff]  }
  0xce   : > { %v5790_v3 = vld [vmem:[%s6160_s10 + $0x44] ss:$0 sps:$4 sm:$0x11]  }
  0xcf   : > { %v1439_v19 = vsel %vm562_vm0, %v1434_v13, %v1438_v11  ;;  %v1788_v20 = vsel %vm963_vm1, %v1786_v14, %v1787_v16  ;;  %v1474_v11 = vrot.slane %v1472_v7, 1  ;;  %v5776_v13 = vld [vmem:[%s6160_s10 + $0x78] sm:$0xff]   ;;  %v1470_v14 = vor.u32 %v1469_v8, %v1465_v2  ;;  %v5791_v8 = vld [vmem:[%s6160_s10 + $0x90] sm:$0xff]  }
  0xd0   : > { %v2185_v16 = vshrl.u32 %v5774_v9, 16  ;;  %v1477_v23 = vshrl.u32 %v5776_v13, 16  ;;  %v1479_v27 = vshll.u32 %v5776_v13, 16  ;;  %v5789_v2 = vld [vmem:[%s6160_s10 + $0x3c] sm:$0xff]   ;;  %v2216_v7 = vshll.u32 %v5790_v3, 16 }
  0xd1   : > { %v1501_v12 = vshrl.u32 %v5791_v8, 16  ;;  %v1503_v13 = vshll.u32 %v5791_v8, 16  ;;  %v5811_v3 = vld [vmem:[%s6160_s10 + $0x60] sm:$0xff]  }
  0xd3   : > { %3654 = vmatmul.mubr.bf16.gmra.mrb[60].mxu1 %v999_v26  ;;  %3751 = vmatmul.mubr.bf16.gmra.mrb[60].mxu0 %v1415_v40  ;;  %v1446_v26 = vor.u32 %v1445_v24, %v1441_v10  ;;  %v5761_v40 = vld [vmem:[%s6160_s10 + $0xbc] ss:$0 sps:$4 sm:$0x11]   ;;  %v2183_v10 = vsel %vm562_vm0, %v2178_v63, %v2182_v6  ;;  %v2211_v6 = vshll.u32 %v5789_v2, 16 }
  0xd4   : > { %3661 = vmatprep.mubr.bf16.mxu1 %v5730_v18  ;;  %3758 = vmatprep.mubr.bf16.mxu0 %v1782_v41  ;;  %v5751_v18 = vld [vmem:[%s6160_s10 + $0xb0] ss:$0 sps:$4 sm:$0x11]   ;;  %v1791_v41 = vsel %vm963_vm1, %v1789_v36, %v1790_v38  ;;  %v1010_v43 = vrot.slane %v5761_v40, 1 }
  0xd5   : > { %v1007_v22 = vrot.slane %v5751_v18, 1  ;;  %v1451_v33 = vsel %vm562_vm0, %v1446_v26, %v1450_v30  ;;  %v2187_v18 = vshll.u32 %v5774_v9, 16  ;;  %v5777_v26 = vld [vmem:[%s6160_s10 + $0x80] ss:$0 sps:$4 sm:$0x11]  }
  0xd6   : > { %v1011_v48 = vsel %vm963_vm1, %v1009_v42, %v1010_v43  ;;  %v1484_v32 = vshll.u32 %v5777_v26, 16  ;;  %v5780_v38 = vld [vmem:[%s6160_s10 + $0x8c] ss:$0 sps:$4 sm:$0x11]  }
  0xd7   : > { %v1008_v25 = vsel %vm963_vm1, %v1006_v21, %v1007_v22  ;;  %v5775_v21 = vld [vmem:[%s6160_s10 + $0x2c] ss:$0 sps:$4 sm:$0x11]   ;;  %v2189_v22 = vrot.slane %v2187_v18, 1  ;;  %v1799_v42 = vrot.slane %v5780_v38, 1  ;;  %v1505_v18 = vrot.slane %v1503_v13, 1 }
  0xd8   : > { %v1486_v37 = vrot.slane %v1484_v32, 1  ;;  %v5782_v40 = vld [vmem:[%s6160_s10 + $0x38] ss:$0 sps:$4 sm:$0x11]   ;;  %v5800_v38 = vld [vmem:[%s6160_s10 + $0x48] sm:$0xff]  }
  0xd9   : > { %v2190_v29 = vor.u32 %v2189_v22, %v2185_v16  ;;  %v1800_v47 = vsel %vm963_vm1, %v1798_v39, %v1799_v42  ;;  %v5792_v9 = vld [vmem:[%s6160_s10 + $0x98] ss:$0 sps:$4 sm:$0x11]   ;;  %v5796_v16 = vld [vmem:[%s6160_s10 + $0x48] sm:$0xff]  }
  0xda   : > { %v2221_v22 = vshrl.u32 %v5796_v16, 16  ;;  %v5799_v32 = vld [vmem:[%s6160_s10 + $0xa4] ss:$0 sps:$4 sm:$0x11]  }
  0xdb   : > { %3662 = vmatmul.mubr.bf16.gmra.mrb[64].mxu1 %v1002_v46  ;;  %3759 = vmatmul.mubr.bf16.gmra.mrb[64].mxu0 %v1427_v54  ;;  %v1455_v46 = vshll.u32 %v5762_v35, 16  ;;  %v1462_v54 = vrot.slane %v1460_v49, 1  ;;  %v5784_v49 = vld [vmem:[%s6160_s10 + $0x8c] ss:$0 sps:$4 sm:$0x11]  }
  0xdc   : > { %3669 = vmatprep.mubr.bf16.mxu1 %v5740_v52  ;;  %3766 = vmatprep.mubr.bf16.mxu0 %v1785_v62  ;;  %v1794_v62 = vsel %vm963_vm1, %v1792_v55, %v1793_v57  ;;  %v1496_v57 = vshll.u32 %v5784_v49, 16 }
  0xdd   : > { %v1457_v52 = vrot.slane %v1455_v46, 1  ;;  %v2204_v46 = vshll.u32 %v5782_v40, 16 }
  0xde   : > { %v1498_v60 = vrot.slane %v1496_v57, 1 }
  0xdf   : > { %v1458_v56 = vor.u32 %v1457_v52, %v1453_v45  ;;  %v5783_v45 = vld [vmem:[%s6160_s10 + $0x84] sm:$0xff]   ;;  %v5785_v52 = vld [vmem:[%s6160_s10 + $0x30] sm:$0xff]   ;;  %v2206_v53 = vrot.slane %v2204_v46, 1 }
  0xe0   : > { %v1489_v50 = vshrl.u32 %v5783_v45, 16  ;;  %v1491_v51 = vshll.u32 %v5783_v45, 16  ;;  %v5802_v45 = vld [vmem:[%s6160_s10 + $0xa8] sm:$0xfe]  }
  0xe1   : > { %v5803_v46 = vld [vmem:[%s6160_s10 + $0xb0] ss:$0 sps:$4 sm:$0x11]   ;;  %v1807_v49 = vrot.slane %v5802_v45, 1 }
  0xe3   : > { %3670 = vmatmul.mubr.bf16.gmra.mrb[68].mxu1 %v1005_v5  ;;  %3767 = vmatmul.mubr.bf16.gmra.mrb[68].mxu0 %v1439_v19  ;;  %v5771_v5 = vld [vmem:[%s6136_s21 + $0x220] sm:$0xff]   ;;  %v1475_v19 = vsel %vm562_vm0, %v1470_v14, %v1474_v11  ;;  %v2218_v11 = vrot.slane %v2216_v7, 1 }
  0xe4   : > { %3677 = vmatprep.mubr.bf16.mxu1 %v5747_v61  ;;  %3774 = vmatprep.mubr.bf16.mxu0 %v1788_v20  ;;  %v1463_v61 = vsel %vm562_vm0, %v1458_v56, %v1462_v54  ;;  %v1796_v20 = vrot.slane %v5773_v15, 1  ;;  %v5786_v54 = vld [vmem:[%s6136_s21 + $0x228] sm:$0xff]   ;;  %v1493_v56 = vrot.slane %v1491_v51, 1  ;;  %v5793_v14 = vld [vmem:[%s6160_s10 + $0x3c] sm:$0xff]   ;;  %v1508_v15 = vshll.u32 %v5792_v9, 16 }
  0xe5   : > { %5442 = vmatprep.subr.bf16.mxu0 %v5771_v5  ;;  %v5805_v51 = vld [vmem:[%s6160_s10 + $0x5c] ss:$0 sps:$4 sm:$0x11]  }
  0xe6   : > { %5443 = vmatpush3.bf16.msra.mxu0 %v5771_v5  ;;  %v1797_v24 = vsel %vm963_vm1, %v1795_v17, %v1796_v20  ;;  %v1494_v59 = vor.u32 %v1493_v56, %v1489_v50  ;;  %v2209_v5 = vshrl.u32 %v5789_v2, 16  ;;  %v5795_v20 = vld [vmem:[%s6160_s10 + $0xa4] ss:$0 sps:$4 sm:$0x11]   ;;  %v1808_v50 = vrot.slane %v5803_v46, 1 }
  0xe7   : > { %5444 = vmatprep.subr.bf16.mxu0 %v5786_v54  ;;  %v1805_v26 = vrot.slane %v5795_v20, 1  ;;  %v2240_v57 = vshll.u32 %v5805_v51, 16 }
  0xe8   : > { %v1499_v63 = vsel %vm562_vm0, %v1494_v59, %v1498_v60  ;;  %v1809_v56 = vsel %vm963_vm1, %v1807_v49, %v1808_v50 }
  0xea   : > { %5445 = vmatpush3.bf16.msra.mxu0 %v5786_v54 }
  0xeb   : > { %3678 = vmatmul.mubr.bf16.gmra.mrb[72].mxu1 %v1008_v25  ;;  %3775 = vmatmul.mubr.bf16.gmra.mrb[72].mxu0 %v1451_v33  ;;  %v2192_v25 = vshll.u32 %v5775_v21, 16  ;;  %v5781_v33 = vld [vmem:[%s6160_s10 + $0x30] sm:$0xff]   ;;  %v1510_v21 = vrot.slane %v1508_v15, 1 }
  0xec   : > { %3685 = vmatprep.mubr.bf16.mxu1 %v5757_v31  ;;  %3782 = vmatprep.mubr.bf16.mxu0 %v1791_v41  ;;  %v1481_v31 = vrot.slane %v1479_v27, 1  ;;  %v2197_v43 = vshrl.u32 %v5781_v33, 16  ;;  %v2199_v44 = vshll.u32 %v5781_v33, 16  ;;  %v5797_v27 = vld [vmem:[%s6160_s10 + $0x50] ss:$0 sps:$4 sm:$0x11]  }
  0xed   : > { %v2194_v30 = vrot.slane %v2192_v25, 1  ;;  %v2228_v34 = vshll.u32 %v5797_v27, 16  ;;  %v5813_v15 = vld [vmem:[%s6160_s10 + $0xb4] sm:$0xff]  }
  0xee   : > { %v1482_v36 = vor.u32 %v1481_v31, %v1477_v23  ;;  %v5798_v31 = vld [vmem:[%s6160_s10 + $0x9c] sm:$0xff]   ;;  %v1537_v20 = vshrl.u32 %v5813_v15, 16 }
  0xef   : > { %v2195_v35 = vsel %vm562_vm0, %v2190_v29, %v2194_v30  ;;  %v2230_v40 = vrot.slane %v2228_v34, 1  ;;  %v5819_v34 = vld [vmem:[%s6160_s10 + $0x6c] sm:$0xff]  }
  0xf0   : > { %v1487_v41 = vsel %vm562_vm0, %v1482_v36, %v1486_v37  ;;  %v1515_v36 = vshll.u32 %v5798_v31, 16  ;;  %v1520_v37 = vshll.u32 %v5799_v32, 16  ;;  %v2259_v49 = vshll.u32 %v5819_v34, 16 }
  0xf2   : > { %v1517_v42 = vrot.slane %v1515_v36, 1 }
  0xf3   : > { %3686 = vmatmul.mubr.bf16.gmra.mrb[76].mxu1 %v1011_v48  ;;  %3783 = vmatmul.mubr.bf16.gmra.mrb[76].mxu0 %v1463_v61  ;;  %v2201_v48 = vrot.slane %v2199_v44, 1  ;;  %v5787_v61 = vld [vmem:[%s6160_s10 + $0x90] sm:$0xfe]  }
  0xf4   : > { %3790 = vmatprep.mubr.bf16.mxu0 %v1794_v62  ;;  %3887 = vmatprep.mubr.bf16.mxu1 %v2183_v10  ;;  %v5788_v62 = vld [vmem:[%s6160_s10 + $0x98] ss:$0 sps:$4 sm:$0x11]   ;;  %v1801_v0 = vrot.slane %v5787_v61, 1  ;;  %v2213_v10 = vrot.slane %v2211_v6, 1 }
  0xf5   : > { %v2202_v55 = vor.u32 %v2201_v48, %v2197_v43  ;;  %v1802_v1 = vrot.slane %v5788_v62, 1  ;;  %v1522_v43 = vrot.slane %v1520_v37, 1  ;;  %v5808_v62 = vld [vmem:[%s6160_s10 + $0x54] sm:$0xff]   ;;  %v5810_v6 = vld [vmem:[%s6160_s10 + $0xbc] ss:$0 sps:$4 sm:$0x11]  }
  0xf6   : > { %v2214_v17 = vor.u32 %v2213_v10, %v2209_v5  ;;  %v5809_v5 = vld [vmem:[%s6160_s10 + $0xb4] sm:$0xfe]   ;;  %v1811_v10 = vrot.slane %v5810_v6, 1 }
  0xf7   : > { %v2207_v58 = vsel %vm562_vm0, %v2202_v55, %v2206_v53  ;;  %v5806_v55 = vld [vmem:[%s6160_s10 + $0xa8] sm:$0xff]   ;;  %v1810_v9 = vrot.slane %v5809_v5, 1 }
  0xf8   : > { %v2219_v23 = vsel %vm562_vm0, %v2214_v17, %v2218_v11  ;;  %v1525_v60 = vshrl.u32 %v5806_v55, 16  ;;  %v1527_v61 = vshll.u32 %v5806_v55, 16  ;;  %v5812_v11 = vld [vmem:[%s6160_s10 + $0x68] ss:$0 sps:$4 sm:$0x11]   ;;  %v2261_v55 = vrot.slane %v2259_v49, 1 }
  0xf9   : > { %v2252_v17 = vshll.u32 %v5812_v11, 16  ;;  %v5832_v49 = vld [vmem:[%s6160_s10 + $0x8c] ss:$0 sps:$4 sm:$0x11]  }
  0xfa   : > { %v1529_v2 = vrot.slane %v1527_v61, 1 }
  0xfb   : > { %3888 = vmatmul.mubr.bf16.vlgmr.msra.gmra.mrb[80].mxu1 %v5770_v4  ;;  %3791 = vmatmul.mubr.bf16.gmra.mrb[80].mxu0 %v1475_v19  ;;  %v1803_v4 = vsel %vm963_vm1, %v1801_v0, %v1802_v1  ;;  %v5794_v19 = vld [vmem:[%s6160_s10 + $0x9c] sm:$0xfe]  }
  0xfc   : > { %3798 = vmatprep.mubr.bf16.mxu0 %v1797_v24  ;;  %3895 = vmatprep.mubr.bf16.mxu1 %v2195_v35  ;;  %v1506_v24 = vor.u32 %v1505_v18, %v1501_v12  ;;  %v1804_v25 = vrot.slane %v5794_v19, 1  ;;  %v1513_v35 = vshrl.u32 %v5798_v31, 16  ;;  %v1530_v8 = vor.u32 %v1529_v2, %v1525_v60  ;;  %v5814_v18 = vld [vmem:[%s6160_s10 + $0xbc] ss:$0 sps:$4 sm:$0x11]   ;;  %v5823_v60 = vld [vmem:[%s6160_s10 + $0x6c] sm:$0xff]  }
  0xfd   : > { %v2245_v12 = vshrl.u32 %v5811_v3, 16 }
  0xfe   : > { %v1511_v29 = vsel %vm562_vm0, %v1506_v24, %v1510_v21  ;;  %v1806_v30 = vsel %vm963_vm1, %v1804_v25, %v1805_v26  ;;  %v1518_v48 = vor.u32 %v1517_v42, %v1513_v35  ;;  %v1539_v21 = vshll.u32 %v5813_v15, 16  ;;  %v5816_v26 = vld [vmem:[%s6136_s21 + $0x238] sm:$0xff]   ;;  %v5817_v42 = vld [vmem:[%s6160_s10 + $0xc0] sm:$0xfe]  }
  0xff   : > { %v1544_v24 = vshll.u32 %v5814_v18, 16  ;;  %v1813_v45 = vrot.slane %v5817_v42, 1 }
 0x100   : > { %v1523_v53 = vsel %vm562_vm0, %v1518_v48, %v1522_v43  ;;  %v5818_v43 = vld [vmem:[%s6160_s10 + $0xc8] ss:$0 sps:$4 sm:$0x11]   ;;  %v2257_v48 = vshrl.u32 %v5819_v34, 16 }
 0x101   : > { %v1814_v46 = vrot.slane %v5818_v43, 1  ;;  %v5831_v43 = vld [vmem:[%s6160_s10 + $0x84] sm:$0xff]  }
 0x103   : > { %3896 = vmatmul.mubr.bf16.gmra.mrb[84].mxu1 %v5778_v28  ;;  %3799 = vmatmul.mubr.bf16.gmra.mrb[84].mxu0 %v1487_v41  ;;  %v2223_v28 = vshll.u32 %v5796_v16, 16  ;;  %v5801_v41 = vld [vmem:[%s6136_s21 + $0x230] sm:$0xff]   ;;  %v1812_v16 = vsel %vm963_vm1, %v1810_v9, %v1811_v10  ;;  %v1815_v51 = vsel %vm963_vm1, %v1813_v45, %v1814_v46  ;;  %s5910_s21 = scalar_lea.vmem %s6972_s6, 4096 }
 0x104   : > { %3806 = vmatprep.mubr.bf16.mxu0 %v1800_v47  ;;  %3903 = vmatprep.mubr.bf16.mxu1 %v2207_v58  ;;  %v5804_v47 = vld [vmem:[%s6160_s10 + $0x54] sm:$0xff]   ;;  %v5807_v58 = vld [vmem:[%s6160_s10 + $0xb0] ss:$0 sps:$4 sm:$0x11]   ;;  %p5911_p8 = scmp.ne.s32.totalorder %s6972_s6, %s5910_s21  ;;  %p5918_p2 = scmp.lt.s32.totalorder %s5916_s7, %s5910_s21 }
 0x105   : > { %v2225_v33 = vrot.slane %v2223_v28, 1  ;;  %5446 = vmatprep.subr.bf16.mxu0 %v5801_v41  ;;  %v2235_v54 = vshll.u32 %v5804_v47, 16  ;;  %v1532_v0 = vshll.u32 %v5807_v58, 16  ;;  %v1541_v28 = vrot.slane %v1539_v21, 1 }
 0x106   : > { %5447 = vmatpush3.bf16.msra.mxu0 %v5801_v41  ;;  %p5912_p0 = pnand %p5911_p8, %p7036_p11  ;;  %p5919_p4 = por %p5918_p2, %p5917_p13 }
 0x107   : > { %v2226_v39 = vor.u32 %v2225_v33, %v2221_v22  ;;  %v2237_v59 = vrot.slane %v2235_v54, 1  ;;  %v5815_v22 = vld [vmem:[%s6160_s10 + $0x60] sm:$0xff]   ;;  %5448 = vmatprep.subr.bf16.mxu0 %v5816_v26  ;;  %v1542_v36 = vor.u32 %v1541_v28, %v1537_v20 }
 0x108   : > { %v5821_v54 = vld [vmem:[%s6160_s10 + $0xc0] sm:$0xff]   ;;  %p5913_p5 = pneg %p5912_p0 }
 0x109   : > { %v2231_v44 = vsel %vm562_vm0, %v2226_v39, %v2230_v40  ;;  %v1549_v58 = vshrl.u32 %v5821_v54, 16 }
 0x10a   : > { %5449 = vmatpush3.bf16.msra.mxu0 %v5816_v26  ;;  %v5828_v26 = vld [vmem:[%s6160_s10 + $0x78] sm:$0xff]   ;;  %p5920_p6 = pnand %p5919_p4, %p5913_p5 }
 0x10b   : > { %3904 = vmatmul.mubr.bf16.gmra.mrb[88].mxu1 %v5785_v52  ;;  %3807 = vmatmul.mubr.bf16.gmra.mrb[88].mxu0 %v1499_v63  ;;  %v2233_v52 = vshrl.u32 %v5804_v47, 16  ;;  %v2242_v63 = vrot.slane %v2240_v57, 1  ;;  %v5820_v47 = vld [vmem:[%s6160_s10 + $0x74] ss:$0 sps:$4 sm:$0x11]  }
 0x10c   : > { %3814 = vmatprep.mubr.bf16.mxu0 %v1803_v4  ;;  %3911 = vmatprep.mubr.bf16.mxu1 %v2219_v23  ;;  %v1534_v4 = vrot.slane %v1532_v0, 1  ;;  %v2254_v23 = vrot.slane %v2252_v17, 1 }
 0x10d   : > { %v2238_v1 = vor.u32 %v2237_v59, %v2233_v52  ;;  %v2264_v52 = vshll.u32 %v5820_v47, 16  ;;  %v1551_v59 = vshll.u32 %v5821_v54, 16  ;;  %v2288_v54 = vshll.u32 %v5832_v49, 16 }
 0x10e   : > { %v1535_v13 = vsel %vm562_vm0, %v1530_v8, %v1534_v4 }
 0x10f   : > { %v2243_v7 = vsel %vm562_vm0, %v2238_v1, %v2242_v63  ;;  %v2266_v57 = vrot.slane %v2264_v52, 1  ;;  %v2262_v63 = vor.u32 %v2261_v55, %v2257_v48  ;;  %v1553_v4 = vrot.slane %v1551_v59, 1  ;;  %v5833_v55 = vld [vmem:[%s6160_s10 + $0x30] sm:$0xfe]  }
 0x111   : > { %v2267_v9 = vsel %vm562_vm0, %v2262_v63, %v2266_v57 }
 0x113   : > { %3912 = vmatmul.mubr.bf16.gmra.mrb[92].mxu1 %v5793_v14  ;;  %3815 = vmatmul.mubr.bf16.gmra.mrb[92].mxu0 %v1511_v29  ;;  %v2247_v14 = vshll.u32 %v5811_v3, 16  ;;  %v5824_v3 = vld [vmem:[%s6160_s10 + $0x78] sm:$0xff]  }
 0x114   : > { %3822 = vmatprep.mubr.bf16.mxu0 %v1806_v30  ;;  %3919 = vmatprep.mubr.bf16.mxu1 %v2231_v44  ;;  %v1546_v30 = vrot.slane %v1544_v24, 1  ;;  %v5827_v24 = vld [vmem:[%s6160_s10 + $0x20] ss:$0 sps:$4 sm:$0x11]  }
 0x115   : > { %v2249_v19 = vrot.slane %v2247_v14, 1  ;;  %v1554_v14 = vor.u32 %v1553_v4, %v1549_v58  ;;  %v5834_v58 = vld [vmem:[%s6160_s10 + $0x38] ss:$0 sps:$4 sm:$0x11]  }
 0x116   : > { %v1547_v44 = vsel %vm562_vm0, %v1542_v36, %v1546_v30 }
 0x117   : > { %v2250_v27 = vor.u32 %v2249_v19, %v2245_v12  ;;  %v2269_v12 = vshrl.u32 %v5824_v3, 16 }
 0x119   : > { %v2255_v35 = vsel %vm562_vm0, %v2250_v27, %v2254_v23  ;;  %v5826_v23 = vld [vmem:[%s6160_s10 + $0x18] sm:$0xfe]  }
 0x11a   : > { %v2572_v28 = vrot.slane %v5826_v23, 1 }
 0x11b   : > { %3920 = vmatmul.mubr.bf16.gmra.mrb[96].mxu1 %v5800_v38  ;;  %3823 = vmatmul.mubr.bf16.gmra.mrb[96].mxu0 %v1523_v53 }
 0x11c   : > { %3830 = vmatprep.mubr.bf16.mxu0 %v1809_v56  ;;  %3927 = vmatprep.mubr.bf16.mxu1 %v2243_v7  ;;  %v5822_v56 = vld [vmem:[%s6160_s10 + $0xc8] ss:$0 sps:$4 sm:$0x11]  }
 0x11d   : > { %v1556_v0 = vshll.u32 %v5822_v56, 16 }
 0x11f   : > { %v1558_v10 = vrot.slane %v1556_v0, 1 }
 0x121   : > { %v1559_v21 = vsel %vm562_vm0, %v1554_v14, %v1558_v10  ;;  %v5838_v14 = vld [vmem:[%s6160_s10 + $0x90] sm:$0xff]  }
 0x122   : > { %v2293_v23 = vshrl.u32 %v5838_v14, 16 }
 0x123   : > { %3928 = vmatmul.mubr.bf16.gmra.mrb[100].mxu1 %v5808_v62  ;;  %3831 = vmatmul.mubr.bf16.gmra.mrb[100].mxu0 %v1535_v13  ;;  %v2271_v13 = vshll.u32 %v5824_v3, 16  ;;  %v5836_v3 = vld [vmem:[%s6160_s10 + $0x3c] sm:$0xfe]  }
 0x124   : > { %3838 = vmatprep.mubr.bf16.mxu0 %v1812_v16  ;;  %3935 = vmatprep.mubr.bf16.mxu1 %v2255_v35  ;;  %v5825_v16 = vld [vmem:[%s6160_s10 + $0x80] ss:$0 sps:$4 sm:$0x11]  }
 0x125   : > { %v2273_v18 = vrot.slane %v2271_v13, 1 }
 0x12b   : > { %3936 = vmatmul.mubr.bf16.gmra.mrb[104].mxu1 %v5815_v22  ;;  %3839 = vmatmul.mubr.bf16.gmra.mrb[104].mxu0 %v1547_v44  ;;  %v2276_v22 = vshll.u32 %v5825_v16, 16  ;;  %v2581_v16 = vrot.slane %v5836_v3, 1 }
 0x12c   : > { %3846 = vmatprep.mubr.bf16.mxu0 %v1815_v51  ;;  %3943 = vmatprep.mubr.bf16.mxu1 %v2267_v9  ;;  %v2283_v51 = vshll.u32 %v5831_v43, 16 }
 0x12d   : > { %v2278_v27 = vrot.slane %v2276_v22, 1  ;;  %v5839_v22 = vld [vmem:[%s6160_s10 + $0x98] ss:$0 sps:$4 sm:$0x11]  }
 0x12e   : > { %v5050_v25 = vpop.f32.mrb[0].mxu1  ;;  %v4978_v32 = vpop.f32.mrb[0].mxu0  ;;  %v2285_v57 = vrot.slane %v2283_v51, 1  ;;  %v5844_v51 = vld [vmem:[%s6160_s10 + $0x5c] ss:$0 sps:$4 sm:$0x11]  }
 0x12f   : > { %v5051_v29 = vpop.f32.mrb[1].mxu1  ;;  %v4979_v37 = vpop.f32.mrb[1].mxu0 }
 0x130   : > { %v6468_v31 = vadd.f32 %v5051_v29, %v5050_v25  ;;  %v5053_v33 = vpop.f32.mrb[2].mxu1  ;;  %v6472_v39 = vadd.f32 %v4979_v37, %v4978_v32  ;;  %v4981_v41 = vpop.f32.mrb[2].mxu0  ;;  %v2274_v25 = vor.u32 %v2273_v18, %v2269_v12  ;;  %v2573_v29 = vrot.slane %v5827_v24, 1  ;;  %v5829_v32 = vld [vmem:[%s6160_s10 + $0x24] sm:$0xfe]  }
 0x131   : > { %v5054_v38 = vpop.f32.mrb[3].mxu1  ;;  %v4982_v50 = vpop.f32.mrb[3].mxu0  ;;  %v2575_v44 = vrot.slane %v5829_v32, 1  ;;  %v2295_v24 = vshll.u32 %v5838_v14, 16  ;;  %v5849_v14 = vld [vmem:[%s6160_s10 + $0x9c] sm:$0xff]  }
 0x132   : > { %v6474_v40 = vadd.f32 %v5054_v38, %v5053_v33  ;;  %v6481_v53 = vadd.f32 %v4982_v50, %v4981_v41  ;;  %v2279_v36 = vsel %vm562_vm0, %v2274_v25, %v2278_v27  ;;  %v2574_v37 = vsel %vm963_vm1, %v2572_v28, %v2573_v29  ;;  %v5830_v38 = vld [vmem:[%s6160_s10 + $0x2c] ss:$0 sps:$4 sm:$0x11]  }
 0x133   : > { %3944 = vmatmul.mubr.bf16.gmra.mrb[108].mxu1 %v5823_v60  ;;  %3847 = vmatmul.mubr.bf16.gmra.mrb[108].mxu0 %v1559_v21  ;;  %v2576_v48 = vrot.slane %v5830_v38, 1  ;;  %v2281_v50 = vshrl.u32 %v5831_v43, 16  ;;  %v2290_v60 = vrot.slane %v2288_v54, 1  ;;  %v5840_v27 = vld [vmem:[%s6160_s10 + $0x48] sm:$0xfe]   ;;  %v2297_v29 = vrot.slane %v2295_v24, 1 }
 0x134   : > { %3951 = vmatprep.mubr.bf16.mxu1 %v2279_v36  ;;  %5450 = vmatprep.mubr.bf16.mxu0 %v2574_v37  ;;  %v5842_v36 = vld [vmem:[%s6160_s10 + $0x90] sm:$0xff]  }
 0x135   : > { %v2577_v52 = vsel %vm963_vm1, %v2575_v44, %v2576_v48  ;;  %v2286_v0 = vor.u32 %v2285_v57, %v2281_v50  ;;  %v2298_v38 = vor.u32 %v2297_v29, %v2293_v23  ;;  %v5843_v43 = vld [vmem:[%s6160_s10 + $0x54] sm:$0xfe]  }
 0x136   : > { %v5056_v61 = vpop.f32.mrb[4].mxu1  ;;  %v4984_v62 = vpop.f32.mrb[4].mxu0 }
 0x137   : > { %v5057_v1 = vpop.f32.mrb[5].mxu1  ;;  %v4985_v2 = vpop.f32.mrb[5].mxu0  ;;  %v2291_v9 = vsel %vm562_vm0, %v2286_v0, %v2290_v60 }
 0x138   : > { %v6487_v5 = vadd.f32 %v5057_v1, %v5056_v61  ;;  %v5059_v6 = vpop.f32.mrb[6].mxu1  ;;  %v6489_v7 = vadd.f32 %v4985_v2, %v4984_v62  ;;  %v4987_v8 = vpop.f32.mrb[6].mxu0  ;;  %v2578_v61 = vrot.slane %v5833_v55, 1  ;;  %v5835_v62 = vld [vmem:[%s6160_s10 + $0x84] sm:$0xff]   ;;  %v2579_v1 = vrot.slane %v5834_v58, 1  ;;  %v5845_v55 = vld [vmem:[%s6160_s10 + $0x9c] sm:$0xff]  }
 0x139   : > { %v5060_v11 = vpop.f32.mrb[7].mxu1  ;;  %v4988_v17 = vpop.f32.mrb[7].mxu0 }
 0x13a   : > { %v6492_v15 = vadd.f32 %v5060_v11, %v5059_v6  ;;  %v6495_v19 = vadd.f32 %v4988_v17, %v4987_v8  ;;  %v2580_v10 = vsel %vm963_vm1, %v2578_v61, %v2579_v1  ;;  %v5837_v11 = vld [vmem:[%s6160_s10 + $0x44] ss:$0 sps:$4 sm:$0x11]   ;;  %v2305_v1 = vshrl.u32 %v5845_v55, 16 }
 0x13b   : > { %3952 = vmatmul.mubr.bf16.gmra.mrb[112].mxu1 %v5828_v26  ;;  %5451 = vmatmul.mubr.bf16.vlgmr.msra.gmra.mrb[112].mxu0 %v2577_v52  ;;  %v2582_v21 = vrot.slane %v5837_v11, 1  ;;  %v2300_v26 = vshll.u32 %v5839_v22, 16  ;;  %v5850_v22 = vld [vmem:[%s6160_s10 + $0x6c] sm:$0xfe]  }
 0x13c   : > { %3959 = vmatprep.mubr.bf16.mxu1 %v2291_v9  ;;  %5454 = vmatprep.mubr.bf16.mxu0 %v2580_v10  ;;  %v5848_v10 = vld [vmem:[%s6160_s10 + $0x68] ss:$0 sps:$4 sm:$0x11]  }
 0x13d   : > { %v2583_v25 = vsel %vm963_vm1, %v2581_v16, %v2582_v21 }
 0x13e   : > { %v5062_v20 = vpop.f32.mrb[8].mxu1  ;;  %v4990_v34 = vpop.f32.mrb[8].mxu0 }
 0x13f   : > { %v5063_v30 = vpop.f32.mrb[9].mxu1  ;;  %v4991_v41 = vpop.f32.mrb[9].mxu0 }
 0x140   : > { %v6502_v33 = vadd.f32 %v5063_v30, %v5062_v20  ;;  %v5065_v35 = vpop.f32.mrb[10].mxu1  ;;  %v6508_v45 = vadd.f32 %v4991_v41, %v4990_v34  ;;  %v4993_v47 = vpop.f32.mrb[10].mxu0  ;;  %v5841_v30 = vld [vmem:[%s6160_s10 + $0x50] ss:$0 sps:$4 sm:$0x11]   ;;  %v2302_v34 = vrot.slane %v2300_v26, 1 }
 0x141   : > { %v5066_v42 = vpop.f32.mrb[11].mxu1  ;;  %v4994_v56 = vpop.f32.mrb[11].mxu0  ;;  %v2585_v41 = vrot.slane %v5841_v30, 1 }
 0x142   : > { %v6510_v46 = vadd.f32 %v5066_v42, %v5065_v35  ;;  %v6516_v59 = vadd.f32 %v4994_v56, %v4993_v47  ;;  %v2584_v35 = vrot.slane %v5840_v27, 1  ;;  %v2303_v49 = vsel %vm562_vm0, %v2298_v38, %v2302_v34  ;;  %v5852_v34 = vld [vmem:[%s6160_s10 + $0xa8] sm:$0xff]  }
 0x143   : > { %3960 = vmatmul.mubr.bf16.gmra.mrb[116].mxu1 %v5835_v62  ;;  %5455 = vmatmul.mubr.bf16.gmra.mrb[116].mxu0 %v2583_v25  ;;  %v2587_v56 = vrot.slane %v5843_v43, 1  ;;  %v2588_v62 = vrot.slane %v5844_v51, 1  ;;  %v5853_v43 = vld [vmem:[%s6160_s10 + $0xb0] ss:$0 sps:$4 sm:$0x11]  }
 0x144   : > { %v2586_v50 = vsel %vm963_vm1, %v2584_v35, %v2585_v41  ;;  %3967 = vmatprep.mubr.bf16.mxu1 %v2303_v49  ;;  %v2593_v35 = vrot.slane %v5850_v22, 1 }
 0x145   : > { %5458 = vmatprep.mubr.bf16.mxu0 %v2586_v50  ;;  %v2589_v3 = vsel %vm963_vm1, %v2587_v56, %v2588_v62  ;;  %v2324_v50 = vshll.u32 %v5853_v43, 16  ;;  %v5863_v43 = vld [vmem:[%s6160_s10 + $0xb4] sm:$0xff]  }
 0x146   : > { %v5068_v63 = vpop.f32.mrb[12].mxu1  ;;  %v4996_v6 = vpop.f32.mrb[12].mxu0 }
 0x147   : > { %v5069_v2 = vpop.f32.mrb[13].mxu1  ;;  %v4997_v12 = vpop.f32.mrb[13].mxu0  ;;  %v2326_v56 = vrot.slane %v2324_v50, 1  ;;  %v5864_v50 = vld [vmem:[%s6160_s10 + $0x9c] sm:$0xfe]  }
 0x148   : > { %v6520_v4 = vadd.f32 %v5069_v2, %v5068_v63  ;;  %v5071_v8 = vpop.f32.mrb[14].mxu1  ;;  %v6526_v17 = vadd.f32 %v4997_v12, %v4996_v6  ;;  %v4999_v20 = vpop.f32.mrb[14].mxu0  ;;  %v5846_v63 = vld [vmem:[%s6160_s10 + $0xa4] ss:$0 sps:$4 sm:$0x11]   ;;  %v2307_v2 = vshll.u32 %v5845_v55, 16 }
 0x149   : > { %v5072_v13 = vpop.f32.mrb[15].mxu1  ;;  %v5000_v28 = vpop.f32.mrb[15].mxu0  ;;  %v2312_v6 = vshll.u32 %v5846_v63, 16 }
 0x14a   : > { %v6528_v18 = vadd.f32 %v5072_v13, %v5071_v8  ;;  %v6534_v32 = vadd.f32 %v5000_v28, %v4999_v20  ;;  %v2309_v9 = vrot.slane %v2307_v2, 1  ;;  %v2591_v20 = vrot.slane %v5848_v10, 1  ;;  %v5851_v28 = vld [vmem:[%s6160_s10 + $0x74] ss:$0 sps:$4 sm:$0x11]  }
 0x14b   : > { %3968 = vmatmul.mubr.bf16.gmra.mrb[120].mxu1 %v5842_v36  ;;  %5459 = vmatmul.mubr.bf16.gmra.mrb[120].mxu0 %v2589_v3  ;;  %v2314_v12 = vrot.slane %v2312_v6, 1  ;;  %v5857_v2 = vld [vmem:[%s6160_s10 + $0x84] sm:$0xfe]   ;;  %v5858_v10 = vld [vmem:[%s6160_s10 + $0x8c] ss:$0 sps:$4 sm:$0x11]  }
 0x14c   : > { %v2310_v16 = vor.u32 %v2309_v9, %v2305_v1 }
 0x14e   : > { %v5090_v37 = vpop.f32.mrb[16].mxu1  ;;  %v5002_v47 = vpop.f32.mrb[16].mxu0  ;;  %v2315_v26 = vsel %vm562_vm0, %v2310_v16, %v2314_v12 }
 0x14f   : > { %v5091_v42 = vpop.f32.mrb[17].mxu1  ;;  %v5003_v52 = vpop.f32.mrb[17].mxu0  ;;  %3975 = vmatprep.mubr.bf16.mxu1 %v2315_v26 }
 0x150   : > { %v5092_v44 = vadd.f32 %v5091_v42, %v5090_v37  ;;  %v5093_v48 = vpop.f32.mrb[18].mxu1  ;;  %v6545_v58 = vadd.f32 %v5003_v52, %v5002_v47  ;;  %v5005_v61 = vpop.f32.mrb[18].mxu0  ;;  %v2594_v42 = vrot.slane %v5851_v28, 1  ;;  %v2317_v47 = vshrl.u32 %v5852_v34, 16 }
 0x151   : > { %v5094_v54 = vpop.f32.mrb[19].mxu1  ;;  %v5006_v8 = vpop.f32.mrb[19].mxu0 }
 0x152   : > { %v6543_v57 = vadd.f32 %v5092_v44, %v6472_v39  ;;  %v5095_v60 = vadd.f32 %v5094_v54, %v5093_v48  ;;  %v5847_v39 = vld [vmem:[%s6160_s10 + $0x60] sm:$0xfe]   ;;  %v6554_v11 = vadd.f32 %v5006_v8, %v5005_v61  ;;  %v2319_v48 = vshll.u32 %v5852_v34, 16  ;;  %v5855_v54 = vld [vmem:[%s6160_s10 + $0x80] ss:$0 sps:$4 sm:$0x11]  }
 0x153   : > { %v2590_v13 = vrot.slane %v5847_v39, 1  ;;  %3976 = vmatmul.mubr.bf16.gmra.mrb[124].mxu1 %v5849_v14  ;;  %v2595_v49 = vsel %vm963_vm1, %v2593_v35, %v2594_v42  ;;  %v5856_v61 = vld [vmem:[%s6160_s10 + $0xa8] sm:$0xff]   ;;  %v2597_v63 = vrot.slane %v5855_v54, 1  ;;  %v5859_v14 = vld [vmem:[%s6160_s10 + $0xb4] sm:$0xff]  }
 0x154   : > { %v6549_v0 = vadd.f32 %v5095_v60, %v6481_v53  ;;  %v2321_v52 = vrot.slane %v2319_v48, 1  ;;  %v2329_v26 = vshrl.u32 %v5859_v14, 16  ;;  %v5862_v35 = vld [vmem:[%s6160_s10 + $0x98] ss:$0 sps:$4 sm:$0x11]  }
 0x155   : > { %v2592_v27 = vsel %vm963_vm1, %v2590_v13, %v2591_v20  ;;  %v2603_v48 = vrot.slane %v5862_v35, 1 }
 0x156   : > { %v5096_v53 = vpop.f32.mrb[20].mxu1  ;;  %v5008_v24 = vpop.f32.mrb[20].mxu0  ;;  %5462 = vmatprep.mubr.bf16.mxu0 %v2592_v27  ;;  %v2322_v62 = vor.u32 %v2321_v52, %v2317_v47  ;;  %v2331_v27 = vshll.u32 %v5859_v14, 16 }
 0x157   : > { %v5097_v21 = vpop.f32.mrb[21].mxu1  ;;  %v5009_v29 = vpop.f32.mrb[21].mxu0  ;;  %5463 = vmatmul.mubr.bf16.gmra.mrb[124].mxu0 %v2595_v49 }
 0x158   : > { %v5098_v23 = vadd.f32 %v5097_v21, %v5096_v53  ;;  %v5099_v25 = vpop.f32.mrb[22].mxu1  ;;  %v6565_v37 = vadd.f32 %v5009_v29, %v5008_v24  ;;  %v5011_v41 = vpop.f32.mrb[22].mxu0  ;;  %v2327_v8 = vsel %vm562_vm0, %v2322_v62, %v2326_v56  ;;  %v2599_v53 = vrot.slane %v5857_v2, 1  ;;  %v5860_v24 = vld [vmem:[%s6160_s10 + $0xbc] ss:$0 sps:$4 sm:$0x11]  }
 0x159   : > { %v5100_v30 = vpop.f32.mrb[23].mxu1  ;;  %v5012_v51 = vpop.f32.mrb[23].mxu0  ;;  %3983 = vmatprep.mubr.bf16.mxu1 %v2327_v8  ;;  %v2336_v29 = vshll.u32 %v5860_v24, 16  ;;  %v2333_v34 = vrot.slane %v2331_v27, 1  ;;  %v5866_v62 = vld [vmem:[%s6160_s10 + $0xc0] sm:$0xff]  }
 0x15a   : > { %v6563_v36 = vadd.f32 %v5098_v23, %v6489_v7  ;;  %v5101_v38 = vadd.f32 %v5100_v30, %v5099_v25  ;;  %v5854_v7 = vld [vmem:[%s6160_s10 + $0x78] sm:$0xfe]   ;;  %v6574_v55 = vadd.f32 %v5012_v51, %v5011_v41  ;;  %v2600_v23 = vrot.slane %v5858_v10, 1  ;;  %v5867_v8 = vld [vmem:[%s6160_s10 + $0xc8] ss:$0 sps:$4 sm:$0x11]  }
 0x15b   : > { %v2596_v60 = vrot.slane %v5854_v7, 1  ;;  %3984 = vmatmul.mubr.bf16.gmra.mrb[128].mxu1 %v5856_v61  ;;  %v2338_v41 = vrot.slane %v2336_v29, 1  ;;  %v2334_v47 = vor.u32 %v2333_v34, %v2329_v26  ;;  %v2341_v10 = vshrl.u32 %v5866_v62, 16  ;;  %v5870_v27 = vld [vmem:[%s6160_s10 + $0xc0] sm:$0xff]  }
 0x15c   : > { %v6569_v44 = vadd.f32 %v5101_v38, %v6495_v19  ;;  %v2601_v28 = vsel %vm963_vm1, %v2599_v53, %v2600_v23  ;;  %v2348_v14 = vshll.u32 %v5867_v8, 16  ;;  %v5876_v8 = vld [vmem:[%s6160_s10 + $0xc8] ss:$0 sps:$4 sm:$0x11]  }
 0x15d   : > { %v2598_v9 = vsel %vm963_vm1, %v2596_v60, %v2597_v63  ;;  %v2339_v54 = vsel %vm562_vm0, %v2334_v47, %v2338_v41  ;;  %v5865_v60 = vld [vmem:[%s6160_s10 + $0xa4] ss:$0 sps:$4 sm:$0x11]   ;;  %v2605_v63 = vrot.slane %v5864_v50, 1 }
 0x15e   : > { %v5102_v19 = vpop.f32.mrb[24].mxu1  ;;  %v5014_v6 = vpop.f32.mrb[24].mxu0  ;;  %5466 = vmatprep.mubr.bf16.mxu0 %v2598_v9  ;;  %3991 = vmatprep.mubr.bf16.mxu1 %v2339_v54  ;;  %v2350_v24 = vrot.slane %v2348_v14, 1  ;;  %v5877_v14 = vld [vmem:[%s6160_s10 + $0xcc] sm:$0xff]  }
 0x15f   : > { %v5103_v1 = vpop.f32.mrb[25].mxu1  ;;  %v5015_v12 = vpop.f32.mrb[25].mxu0  ;;  %5467 = vmatmul.mubr.bf16.gmra.mrb[128].mxu0 %v2601_v28 }
 0x160   : > { %v5104_v3 = vadd.f32 %v5103_v1, %v5102_v19  ;;  %v5105_v39 = vpop.f32.mrb[26].mxu1  ;;  %v6585_v20 = vadd.f32 %v5015_v12, %v5014_v6  ;;  %v5017_v22 = vpop.f32.mrb[26].mxu0  ;;  %v2343_v12 = vshll.u32 %v5866_v62, 16 }
 0x161   : > { %v5106_v13 = vpop.f32.mrb[27].mxu1  ;;  %v5018_v30 = vpop.f32.mrb[27].mxu0 }
 0x162   : > { %v6583_v16 = vadd.f32 %v5104_v3, %v6508_v45  ;;  %v5107_v21 = vadd.f32 %v5106_v13, %v5105_v39  ;;  %v5861_v45 = vld [vmem:[%s6160_s10 + $0x90] sm:$0xfe]   ;;  %v6594_v38 = vadd.f32 %v5018_v30, %v5017_v22  ;;  %v2606_v39 = vrot.slane %v5865_v60, 1  ;;  %v5869_v22 = vld [vmem:[%s6160_s10 + $0xb0] ss:$0 sps:$4 sm:$0x11]  }
 0x163   : > { %v2602_v42 = vrot.slane %v5861_v45, 1  ;;  %3992 = vmatmul.mubr.bf16.gmra.mrb[132].mxu1 %v5863_v43  ;;  %v2609_v29 = vrot.slane %v5869_v22, 1  ;;  %v5871_v30 = vld [vmem:[%s6160_s10 + $0xb4] sm:$0xfe]   ;;  %v5878_v22 = vld [vmem:[%s6160_s10 + $0xcc] sm:$0xfe]  }
 0x164   : > { %v6589_v25 = vadd.f32 %v5107_v21, %v6516_v59  ;;  %v2607_v13 = vsel %vm963_vm1, %v2605_v63, %v2606_v39  ;;  %v2345_v21 = vrot.slane %v2343_v12, 1  ;;  %v2611_v50 = vrot.slane %v5871_v30, 1  ;;  %v5874_v60 = vld [vmem:[%s6160_s10 + $0xd4] ss:$0 sps:$4 sm:$0x11]  }
 0x165   : > { %v2604_v56 = vsel %vm963_vm1, %v2602_v42, %v2603_v48 }
 0x166   : > { %v5108_v59 = vpop.f32.mrb[28].mxu1  ;;  %v5020_v51 = vpop.f32.mrb[28].mxu0  ;;  %5470 = vmatprep.mubr.bf16.mxu0 %v2604_v56  ;;  %v2346_v28 = vor.u32 %v2345_v21, %v2341_v10 }
 0x167   : > { %v5109_v49 = vpop.f32.mrb[29].mxu1  ;;  %v5021_v61 = vpop.f32.mrb[29].mxu0  ;;  %5471 = vmatmul.mubr.bf16.gmra.mrb[132].mxu0 %v2607_v13 }
 0x168   : > { %v5110_v7 = vadd.f32 %v5109_v49, %v5108_v59  ;;  %v5111_v52 = vpop.f32.mrb[30].mxu1  ;;  %v6605_v2 = vadd.f32 %v5021_v61, %v5020_v51  ;;  %v5023_v6 = vpop.f32.mrb[30].mxu0  ;;  %v2351_v42 = vsel %vm562_vm0, %v2346_v28, %v2350_v24  ;;  %v5872_v59 = vld [vmem:[%s6160_s10 + $0xbc] ss:$0 sps:$4 sm:$0x11]   ;;  %v5873_v49 = vld [vmem:[%s6160_s10 + $0xcc] sm:$0xff]  }
 0x169   : > { %v5112_v19 = vpop.f32.mrb[31].mxu1  ;;  %v5024_v53 = vpop.f32.mrb[31].mxu0  ;;  %3999 = vmatprep.mubr.bf16.mxu1 %v2351_v42  ;;  %v2612_v56 = vrot.slane %v5872_v59, 1  ;;  %v2355_v62 = vshll.u32 %v5873_v49, 16 }
 0x16a   : > { %v6603_v1 = vadd.f32 %v5110_v7, %v6526_v17  ;;  %v5113_v3 = vadd.f32 %v5112_v19, %v5111_v52  ;;  %v5868_v17 = vld [vmem:[%s6160_s10 + $0xa8] sm:$0xfe]   ;;  %v6614_v23 = vadd.f32 %v5024_v53, %v5023_v6  ;;  %v2353_v19 = vshrl.u32 %v5873_v49, 16 }
 0x16b   : > { %v2608_v26 = vrot.slane %v5868_v17, 1  ;;  %4000 = vmatmul.mubr.bf16.gmra.mrb[136].mxu1 %v5870_v27  ;;  %v2613_v63 = vsel %vm963_vm1, %v2611_v50, %v2612_v56  ;;  %v2357_v39 = vrot.slane %v2355_v62, 1  ;;  %v2615_v53 = vrot.slane %v5876_v8, 1 }
 0x16c   : > { %v6609_v9 = vadd.f32 %v5113_v3, %v6534_v32  ;;  %v2360_v3 = vshll.u32 %v5874_v60, 16 }
 0x16d   : > { %v2610_v43 = vsel %vm963_vm1, %v2608_v26, %v2609_v29  ;;  %v5879_v29 = vld [vmem:[%s6160_s10 + $0xd4] ss:$0 sps:$4 sm:$0x11]  }
 0x16e   : > { %v5114_v32 = vpop.f32.mrb[32].mxu1  ;;  %v5026_v35 = vpop.f32.mrb[32].mxu0  ;;  %5474 = vmatprep.mubr.bf16.mxu0 %v2610_v43  ;;  %v2362_v12 = vrot.slane %v2360_v3, 1 }
 0x16f   : > { %v5115_v45 = vpop.f32.mrb[33].mxu1  ;;  %v5027_v47 = vpop.f32.mrb[33].mxu0  ;;  %5475 = vmatmul.mubr.bf16.gmra.mrb[136].mxu0 %v2613_v63 }
 0x170   : > { %v5116_v34 = vadd.f32 %v5115_v45, %v5114_v32  ;;  %v5117_v41 = vpop.f32.mrb[34].mxu1  ;;  %v6625_v51 = vadd.f32 %v5027_v47, %v5026_v35  ;;  %v5029_v54 = vpop.f32.mrb[34].mxu0  ;;  %v2618_v47 = vrot.slane %v5879_v29, 1 }
 0x171   : > { %v5118_v48 = vpop.f32.mrb[35].mxu1  ;;  %v5030_v6 = vpop.f32.mrb[35].mxu0 }
 0x172   : > { %v6623_v7 = vadd.f32 %v5116_v34, %v6545_v58  ;;  %v5119_v52 = vadd.f32 %v5118_v48, %v5117_v41  ;;  %v5875_v58 = vld [vmem:[%s6160_s10 + $0xc0] sm:$0xfe]   ;;  %v6634_v10 = vadd.f32 %v5030_v6, %v5029_v54  ;;  %v2617_v34 = vrot.slane %v5878_v22, 1 }
 0x173   : > { %v2614_v13 = vrot.slane %v5875_v58, 1 }
 0x174   : > { %v6629_v61 = vadd.f32 %v5119_v52, %v6554_v11  ;;  %v2358_v11 = vor.u32 %v2357_v39, %v2353_v19  ;;  %v2619_v19 = vsel %vm963_vm1, %v2617_v34, %v2618_v47 }
 0x175   : > { %v2616_v28 = vsel %vm963_vm1, %v2614_v13, %v2615_v53 }
 0x176   : > { %v5120_v17 = vpop.f32.mrb[36].mxu1  ;;  %v5032_v26 = vpop.f32.mrb[36].mxu0  ;;  %v2363_v32 = vsel %vm562_vm0, %v2358_v11, %v2362_v12  ;;  %5478 = vmatprep.mubr.bf16.mxu0 %v2616_v28 }
 0x177   : > { %v5121_v21 = vpop.f32.mrb[37].mxu1  ;;  %v5033_v45 = vpop.f32.mrb[37].mxu0  ;;  %4007 = vmatprep.mubr.bf16.mxu1 %v2363_v32  ;;  %5479 = vmatmul.mubr.bf16.gmra.mrb[140].mxu0 %v2619_v19 }
 0x178   : > { %v5122_v24 = vadd.f32 %v5121_v21, %v5120_v17  ;;  %v5123_v27 = vpop.f32.mrb[38].mxu1  ;;  %v5034_v41 = vadd.f32 %v5033_v45, %v5032_v26  ;;  %v5035_v43 = vpop.f32.mrb[38].mxu0  ;;  %4008 = vmatmul.mubr.bf16.gmra.mrb[140].mxu1 %v5877_v14 }
 0x179   : > { %v5124_v30 = vpop.f32.mrb[39].mxu1  ;;  %v5036_v48 = vpop.f32.mrb[39].mxu0 }
 0x17a   : > { %v6642_v35 = vadd.f32 %v5122_v24, %v6565_v37  ;;  %v5125_v42 = vadd.f32 %v5124_v30, %v5123_v27  ;;  %v5037_v52 = vadd.f32 %v5036_v48, %v5035_v43 }
 0x17c   : > { %v6645_v50 = vadd.f32 %v5125_v42, %v6574_v55 }
 0x17e   : > { %v5126_v59 = vpop.f32.mrb[40].mxu1  ;;  %v5038_v56 = vpop.f32.mrb[40].mxu0 }
 0x17f   : > { %v5127_v49 = vpop.f32.mrb[41].mxu1  ;;  %v5039_v62 = vpop.f32.mrb[41].mxu0 }
 0x180   : > { %v5128_v54 = vadd.f32 %v5127_v49, %v5126_v59  ;;  %v5129_v60 = vpop.f32.mrb[42].mxu1  ;;  %v5040_v3 = vadd.f32 %v5039_v62, %v5038_v56  ;;  %v5041_v6 = vpop.f32.mrb[42].mxu0 }
 0x181   : > { %v5130_v37 = vpop.f32.mrb[43].mxu1  ;;  %v5042_v8 = vpop.f32.mrb[43].mxu0 }
 0x182   : > { %v6649_v63 = vadd.f32 %v5128_v54, %v6585_v20  ;;  %v5131_v58 = vadd.f32 %v5130_v37, %v5129_v60  ;;  %v5043_v13 = vadd.f32 %v5042_v8, %v5041_v6 }
 0x184   : > { %v6652_v55 = vadd.f32 %v5131_v58, %v6594_v38 }
 0x186   : > { %v5132_v39 = vpop.f32.mrb[44].mxu1  ;;  %v5044_v17 = vpop.f32.mrb[44].mxu0 }
 0x187   : > { %v5133_v12 = vpop.f32.mrb[45].mxu1  ;;  %v5045_v53 = vpop.f32.mrb[45].mxu0 }
 0x188   : > { %v5134_v14 = vadd.f32 %v5133_v12, %v5132_v39  ;;  %v5135_v11 = vpop.f32.mrb[46].mxu1  ;;  %v5046_v20 = vadd.f32 %v5045_v53, %v5044_v17  ;;  %v5047_v26 = vpop.f32.mrb[46].mxu0 }
 0x189   : > { %v5136_v21 = vpop.f32.mrb[47].mxu1  ;;  %v5048_v32 = vpop.f32.mrb[47].mxu0 }
 0x18a   : > { %v6655_v22 = vadd.f32 %v5134_v14, %v6605_v2  ;;  %v5137_v24 = vadd.f32 %v5136_v21, %v5135_v11  ;;  %v5049_v38 = vadd.f32 %v5048_v32, %v5047_v26 }
 0x18c   : > { %v6658_v29 = vadd.f32 %v5137_v24, %v6614_v23 }
 0x18e   : > { %v5138_v27 = vpop.f32.mrb[48].mxu1  ;;  %v5202_v42 = vpop.f32.mrb[48].mxu0 }
 0x18f   : > { %v5139_v28 = vpop.f32.mrb[49].mxu1  ;;  %v5203_v2 = vpop.f32.mrb[49].mxu0 }
 0x190   : > { %v5140_v45 = vadd.f32 %v5139_v28, %v5138_v27  ;;  %v5141_v30 = vpop.f32.mrb[50].mxu1  ;;  %v5204_v47 = vadd.f32 %v5203_v2, %v5202_v42  ;;  %v5205_v48 = vpop.f32.mrb[50].mxu0 }
 0x191   : > { %v5142_v34 = vpop.f32.mrb[51].mxu1  ;;  %v5206_v54 = vpop.f32.mrb[51].mxu0 }
 0x192   : > { %v6661_v43 = vadd.f32 %v5140_v45, %v6625_v51  ;;  %v5143_v59 = vadd.f32 %v5142_v34, %v5141_v30  ;;  %v6667_v56 = vadd.f32 %v5204_v47, %v6543_v57  ;;  %v5207_v23 = vadd.f32 %v5206_v54, %v5205_v48 }
 0x194   : > { %v6664_v49 = vadd.f32 %v5143_v59, %v6634_v10  ;;  %v6670_v60 = vadd.f32 %v5207_v23, %v6549_v0 }
 0x196   : > { %v5144_v19 = vpop.f32.mrb[52].mxu1  ;;  %v5208_v58 = vpop.f32.mrb[52].mxu0 }
 0x197   : > { %v5145_v62 = vpop.f32.mrb[53].mxu1  ;;  %v5209_v8 = vpop.f32.mrb[53].mxu0 }
 0x198   : > { %v5146_v37 = vadd.f32 %v5145_v62, %v5144_v19  ;;  %v5147_v51 = vpop.f32.mrb[54].mxu1  ;;  %v5210_v10 = vadd.f32 %v5209_v8, %v5208_v58  ;;  %v5211_v14 = vpop.f32.mrb[54].mxu0 }
 0x199   : > { %v5148_v6 = vpop.f32.mrb[55].mxu1  ;;  %v5212_v57 = vpop.f32.mrb[55].mxu0 }
 0x19a   : > { %v6672_v39 = vadd.f32 %v5146_v37, %v5034_v41  ;;  %v5149_v12 = vadd.f32 %v5148_v6, %v5147_v51  ;;  %v6677_v11 = vadd.f32 %v5210_v10, %v6563_v36  ;;  %v5213_v0 = vadd.f32 %v5212_v57, %v5211_v14 }
 0x19c   : > { %v6674_v17 = vadd.f32 %v5149_v12, %v5037_v52  ;;  %v6680_v21 = vadd.f32 %v5213_v0, %v6569_v44 }
 0x19e   : > { %v5150_v53 = vpop.f32.mrb[56].mxu1  ;;  %v5214_v41 = vpop.f32.mrb[56].mxu0 }
 0x19f   : > { %v5151_v24 = vpop.f32.mrb[57].mxu1  ;;  %v5215_v45 = vpop.f32.mrb[57].mxu0 }
 0x1a0   : > { %v5152_v26 = vadd.f32 %v5151_v24, %v5150_v53  ;;  %v5153_v27 = vpop.f32.mrb[58].mxu1  ;;  %v5216_v52 = vadd.f32 %v5215_v45, %v5214_v41  ;;  %v5217_v34 = vpop.f32.mrb[58].mxu0 }
 0x1a1   : > { %v5154_v32 = vpop.f32.mrb[59].mxu1  ;;  %v5218_v36 = vpop.f32.mrb[59].mxu0 }
 0x1a2   : > { %v6682_v28 = vadd.f32 %v5152_v26, %v5040_v3  ;;  %v5155_v30 = vadd.f32 %v5154_v32, %v5153_v27  ;;  %v6687_v59 = vadd.f32 %v5216_v52, %v6583_v16  ;;  %v5219_v2 = vadd.f32 %v5218_v36, %v5217_v34 }
 0x1a4   : > { %v6684_v42 = vadd.f32 %v5155_v30, %v5043_v13  ;;  %v6690_v44 = vadd.f32 %v5219_v2, %v6589_v25 }
 0x1a6   : > { %v5156_v47 = vpop.f32.mrb[60].mxu1  ;;  %v5220_v37 = vpop.f32.mrb[60].mxu0 }
 0x1a7   : > { %v5157_v48 = vpop.f32.mrb[61].mxu1  ;;  %v5221_v51 = vpop.f32.mrb[61].mxu0 }
 0x1a8   : > { %v5158_v54 = vadd.f32 %v5157_v48, %v5156_v47  ;;  %v5159_v23 = vpop.f32.mrb[62].mxu1  ;;  %v5222_v58 = vadd.f32 %v5221_v51, %v5220_v37  ;;  %v5223_v6 = vpop.f32.mrb[62].mxu0 }
 0x1a9   : > { %v5160_v3 = vpop.f32.mrb[63].mxu1  ;;  %v5224_v16 = vpop.f32.mrb[63].mxu0 }
 0x1aa   : > { %v6692_v19 = vadd.f32 %v5158_v54, %v5046_v20  ;;  %v5161_v62 = vadd.f32 %v5160_v3, %v5159_v23  ;;  %v6697_v12 = vadd.f32 %v5222_v58, %v6603_v1  ;;  %v5225_v25 = vadd.f32 %v5224_v16, %v5223_v6 }
 0x1ac   : > { %v6694_v13 = vadd.f32 %v5161_v62, %v5049_v38  ;;  %v6700_v0 = vadd.f32 %v5225_v25, %v6609_v9 }
 0x1ae   : > { %v5162_v8 = vpop.f32.mrb[64].mxu1  ;;  %v5226_v24 = vpop.f32.mrb[64].mxu0 }
 0x1af   : > { %v5163_v10 = vpop.f32.mrb[65].mxu1  ;;  %v5227_v26 = vpop.f32.mrb[65].mxu0 }
 0x1b0   : > { %v5164_v14 = vadd.f32 %v5163_v10, %v5162_v8  ;;  %v5165_v57 = vpop.f32.mrb[66].mxu1  ;;  %v5228_v41 = vadd.f32 %v5227_v26, %v5226_v24  ;;  %v5229_v1 = vpop.f32.mrb[66].mxu0 }
 0x1b1   : > { %v5166_v20 = vpop.f32.mrb[67].mxu1  ;;  %v5230_v32 = vpop.f32.mrb[67].mxu0 }
 0x1b2   : > { %v6703_v53 = vadd.f32 %v5164_v14, %v6468_v31  ;;  %v5167_v38 = vadd.f32 %v5166_v20, %v5165_v57  ;;  %v6709_v45 = vadd.f32 %v5228_v41, %v6623_v7  ;;  %v5231_v30 = vadd.f32 %v5230_v32, %v5229_v1 }
 0x1b4   : > { %v6706_v27 = vadd.f32 %v5167_v38, %v6474_v40  ;;  %v6712_v9 = vadd.f32 %v5231_v30, %v6629_v61 }
 0x1b6   : > { %v5168_v52 = vpop.f32.mrb[68].mxu1  ;;  %v5232_v48 = vpop.f32.mrb[68].mxu0 }
 0x1b7   : > { %v5169_v34 = vpop.f32.mrb[69].mxu1  ;;  %v5233_v54 = vpop.f32.mrb[69].mxu0 }
 0x1b8   : > { %v5170_v31 = vadd.f32 %v5169_v34, %v5168_v52  ;;  %v5171_v36 = vpop.f32.mrb[70].mxu1  ;;  %v5234_v7 = vadd.f32 %v5233_v54, %v5232_v48  ;;  %v5235_v3 = vpop.f32.mrb[70].mxu0 }
 0x1b9   : > { %v5172_v2 = vpop.f32.mrb[71].mxu1  ;;  %v5236_v62 = vpop.f32.mrb[71].mxu0 }
 0x1ba   : > { %v6715_v47 = vadd.f32 %v5170_v31, %v6487_v5  ;;  %v5173_v40 = vadd.f32 %v5172_v2, %v5171_v36  ;;  %v6721_v61 = vadd.f32 %v5234_v7, %v6642_v35  ;;  %v5237_v51 = vadd.f32 %v5236_v62, %v5235_v3 }
 0x1bc   : > { %v6718_v23 = vadd.f32 %v5173_v40, %v6492_v15  ;;  %v6724_v5 = vadd.f32 %v5237_v51, %v6645_v50 }
 0x1be   : > { %v5174_v37 = vpop.f32.mrb[72].mxu1  ;;  %v5238_v10 = vpop.f32.mrb[72].mxu0 }
 0x1bf   : > { %v5175_v58 = vpop.f32.mrb[73].mxu1  ;;  %v5239_v14 = vpop.f32.mrb[73].mxu0 }
 0x1c0   : > { %v5176_v6 = vadd.f32 %v5175_v58, %v5174_v37  ;;  %v5177_v16 = vpop.f32.mrb[74].mxu1  ;;  %v5240_v20 = vadd.f32 %v5239_v14, %v5238_v10  ;;  %v5241_v35 = vpop.f32.mrb[74].mxu0 }
 0x1c1   : > { %v5178_v8 = vpop.f32.mrb[75].mxu1  ;;  %v5242_v38 = vpop.f32.mrb[75].mxu0 }
 0x1c2   : > { %v6727_v25 = vadd.f32 %v5176_v6, %v6502_v33  ;;  %v5179_v15 = vadd.f32 %v5178_v8, %v5177_v16  ;;  %v6733_v24 = vadd.f32 %v5240_v20, %v6649_v63  ;;  %v5243_v26 = vadd.f32 %v5242_v38, %v5241_v35 }
 0x1c4   : > { %v6730_v57 = vadd.f32 %v5179_v15, %v6510_v46  ;;  %v6736_v50 = vadd.f32 %v5243_v26, %v6652_v55 }
 0x1c6   : > { %v5180_v41 = vpop.f32.mrb[76].mxu1  ;;  %v5244_v34 = vpop.f32.mrb[76].mxu0 }
 0x1c7   : > { %v5181_v1 = vpop.f32.mrb[77].mxu1  ;;  %v5245_v31 = vpop.f32.mrb[77].mxu0 }
 0x1c8   : > { %v5182_v33 = vadd.f32 %v5181_v1, %v5180_v41  ;;  %v5183_v32 = vpop.f32.mrb[78].mxu1  ;;  %v5246_v63 = vadd.f32 %v5245_v31, %v5244_v34  ;;  %v5247_v2 = vpop.f32.mrb[78].mxu0 }
 0x1c9   : > { %v5184_v30 = vpop.f32.mrb[79].mxu1  ;;  %v5248_v40 = vpop.f32.mrb[79].mxu0 }
 0x1ca   : > { %v6739_v52 = vadd.f32 %v5182_v33, %v6520_v4  ;;  %v5185_v46 = vadd.f32 %v5184_v30, %v5183_v32  ;;  %v6745_v48 = vadd.f32 %v5246_v63, %v6655_v22  ;;  %v5249_v55 = vadd.f32 %v5248_v40, %v5247_v2 }
 0x1cc   : > { %v6742_v36 = vadd.f32 %v5185_v46, %v6528_v18  ;;  %v6748_v7 = vadd.f32 %v5249_v55, %v6658_v29 }
 0x1ce   : > { %v5314_v54 = vpop.f32.mrb[80].mxu1  ;;  %v5250_v37 = vpop.f32.mrb[80].mxu0 }
 0x1cf   : > { %v5315_v3 = vpop.f32.mrb[81].mxu1  ;;  %v5251_v58 = vpop.f32.mrb[81].mxu0 }
 0x1d0   : > { %v5316_v4 = vadd.f32 %v5315_v3, %v5314_v54  ;;  %v5317_v62 = vpop.f32.mrb[82].mxu1  ;;  %v5252_v16 = vadd.f32 %v5251_v58, %v5250_v37  ;;  %v5253_v8 = vpop.f32.mrb[82].mxu0 }
 0x1d1   : > { %v5318_v51 = vpop.f32.mrb[83].mxu1  ;;  %v5254_v15 = vpop.f32.mrb[83].mxu0 }
 0x1d2   : > { %v5319_v6 = vadd.f32 %v5318_v51, %v5317_v62  ;;  %v6751_v18 = vadd.f32 %v5316_v4, %v6667_v56  ;;  %v6757_v10 = vadd.f32 %v5252_v16, %v6661_v43  ;;  %v5255_v29 = vadd.f32 %v5254_v15, %v5253_v8 }
 0x1d4   : > { %v6754_v22 = vadd.f32 %v5319_v6, %v6670_v60  ;;  %v6760_v14 = vadd.f32 %v5255_v29, %v6664_v49 }
 0x1d6   : > { %v5320_v20 = vpop.f32.mrb[84].mxu1  ;;  %v5256_v38 = vpop.f32.mrb[84].mxu0 }
 0x1d7   : > { %v5321_v35 = vpop.f32.mrb[85].mxu1  ;;  %v5257_v56 = vpop.f32.mrb[85].mxu0 }
 0x1d8   : > { %v5322_v26 = vadd.f32 %v5321_v35, %v5320_v20  ;;  %v5323_v41 = vpop.f32.mrb[86].mxu1  ;;  %v5258_v33 = vadd.f32 %v5257_v56, %v5256_v38  ;;  %v5259_v32 = vpop.f32.mrb[86].mxu0 }
 0x1d9   : > { %v5324_v1 = vpop.f32.mrb[87].mxu1  ;;  %v5260_v46 = vpop.f32.mrb[87].mxu0 }
 0x1da   : > { %v5325_v30 = vadd.f32 %v5324_v1, %v5323_v41  ;;  %v6763_v60 = vadd.f32 %v5322_v26, %v6677_v11  ;;  %v6766_v43 = vadd.f32 %v5258_v33, %v6672_v39  ;;  %v5261_v34 = vadd.f32 %v5260_v46, %v5259_v32 }
 0x1dc   : > { %v6769_v49 = vadd.f32 %v5325_v30, %v6680_v21  ;;  %v6772_v31 = vadd.f32 %v5261_v34, %v6674_v17 }
 0x1de   : > { %v5326_v63 = vpop.f32.mrb[88].mxu1  ;;  %v5262_v40 = vpop.f32.mrb[88].mxu0 }
 0x1df   : > { %v5327_v2 = vpop.f32.mrb[89].mxu1  ;;  %v5263_v3 = vpop.f32.mrb[89].mxu0 }
 0x1e0   : > { %v5328_v55 = vadd.f32 %v5327_v2, %v5326_v63  ;;  %v5329_v54 = vpop.f32.mrb[90].mxu1  ;;  %v5264_v11 = vadd.f32 %v5263_v3, %v5262_v40  ;;  %v5265_v62 = vpop.f32.mrb[90].mxu0 }
 0x1e1   : > { %v5330_v4 = vpop.f32.mrb[91].mxu1  ;;  %v5266_v51 = vpop.f32.mrb[91].mxu0 }
 0x1e2   : > { %v5331_v37 = vadd.f32 %v5330_v4, %v5329_v54  ;;  %v6775_v39 = vadd.f32 %v5328_v55, %v6687_v59  ;;  %v6778_v21 = vadd.f32 %v5264_v11, %v6682_v28  ;;  %v5267_v58 = vadd.f32 %v5266_v51, %v5265_v62 }
 0x1e4   : > { %v6781_v17 = vadd.f32 %v5331_v37, %v6690_v44  ;;  %v6784_v6 = vadd.f32 %v5267_v58, %v6684_v42 }
 0x1e6   : > { %v5332_v16 = vpop.f32.mrb[92].mxu1  ;;  %v5268_v8 = vpop.f32.mrb[92].mxu0 }
 0x1e7   : > { %v5333_v15 = vpop.f32.mrb[93].mxu1  ;;  %v5269_v29 = vpop.f32.mrb[93].mxu0 }
 0x1e8   : > { %v5334_v20 = vadd.f32 %v5333_v15, %v5332_v16  ;;  %v5335_v35 = vpop.f32.mrb[94].mxu1  ;;  %v5270_v38 = vadd.f32 %v5269_v29, %v5268_v8  ;;  %v5271_v59 = vpop.f32.mrb[94].mxu0 }
 0x1e9   : > { %v5336_v26 = vpop.f32.mrb[95].mxu1  ;;  %v5272_v41 = vpop.f32.mrb[95].mxu0 }
 0x1ea   : > { %v5337_v56 = vadd.f32 %v5336_v26, %v5335_v35  ;;  %v6787_v28 = vadd.f32 %v5334_v20, %v6697_v12  ;;  %v6790_v44 = vadd.f32 %v5270_v38, %v6692_v19  ;;  %v5273_v1 = vadd.f32 %v5272_v41, %v5271_v59 }
 0x1ec   : > { %v6793_v42 = vadd.f32 %v5337_v56, %v6700_v0  ;;  %v6796_v33 = vadd.f32 %v5273_v1, %v6694_v13 }
 0x1ee   : > { %v5338_v32 = vpop.f32.mrb[96].mxu1  ;;  %v5274_v30 = vpop.f32.mrb[96].mxu0 }
 0x1ef   : > { %v5339_v46 = vpop.f32.mrb[97].mxu1  ;;  %v5275_v34 = vpop.f32.mrb[97].mxu0 }
 0x1f0   : > { %v5340_v63 = vadd.f32 %v5339_v46, %v5338_v32  ;;  %v5341_v2 = vpop.f32.mrb[98].mxu1  ;;  %v5276_v40 = vadd.f32 %v5275_v34, %v5274_v30  ;;  %v5277_v55 = vpop.f32.mrb[98].mxu0 }
 0x1f1   : > { %v5342_v12 = vpop.f32.mrb[99].mxu1  ;;  %v5278_v54 = vpop.f32.mrb[99].mxu0 }
 0x1f2   : > { %v5343_v3 = vadd.f32 %v5342_v12, %v5341_v2  ;;  %v6799_v19 = vadd.f32 %v5340_v63, %v6709_v45  ;;  %v6802_v0 = vadd.f32 %v5276_v40, %v6703_v53  ;;  %v5279_v4 = vadd.f32 %v5278_v54, %v5277_v55 }
 0x1f4   : > { %v6805_v13 = vadd.f32 %v5343_v3, %v6712_v9  ;;  %v6808_v11 = vadd.f32 %v5279_v4, %v6706_v27 }
 0x1f6   : > { %v5344_v62 = vpop.f32.mrb[100].mxu1  ;;  %v5280_v37 = vpop.f32.mrb[100].mxu0 }
 0x1f7   : > { %v5345_v51 = vpop.f32.mrb[101].mxu1  ;;  %v5281_v58 = vpop.f32.mrb[101].mxu0 }
 0x1f8   : > { %v5346_v16 = vadd.f32 %v5345_v51, %v5344_v62  ;;  %v5347_v8 = vpop.f32.mrb[102].mxu1  ;;  %v5282_v15 = vadd.f32 %v5281_v58, %v5280_v37  ;;  %v5283_v29 = vpop.f32.mrb[102].mxu0 }
 0x1f9   : > { %v5348_v45 = vpop.f32.mrb[103].mxu1  ;;  %v5284_v20 = vpop.f32.mrb[103].mxu0 }
 0x1fa   : > { %v5349_v35 = vadd.f32 %v5348_v45, %v5347_v8  ;;  %v6811_v53 = vadd.f32 %v5346_v16, %v6721_v61  ;;  %v6814_v9 = vadd.f32 %v5282_v15, %v6715_v47  ;;  %v5285_v38 = vadd.f32 %v5284_v20, %v5283_v29 }
 0x1fc   : > { %v6817_v27 = vadd.f32 %v5349_v35, %v6724_v5  ;;  %v6820_v59 = vadd.f32 %v5285_v38, %v6718_v23  ;;  %v6851_v35 = vld [vmem:[%s231_s28] ss:$0 sm:$0xff] }
 0x1fe   : > { %v5350_v26 = vpop.f32.mrb[104].mxu1  ;;  %v5286_v41 = vpop.f32.mrb[104].mxu0 }
 0x1ff   : > { %v5351_v56 = vpop.f32.mrb[105].mxu1  ;;  %v5287_v1 = vpop.f32.mrb[105].mxu0 }
 0x200   : > { %v5352_v32 = vadd.f32 %v5351_v56, %v5350_v26  ;;  %v5353_v30 = vpop.f32.mrb[106].mxu1  ;;  %v5288_v46 = vadd.f32 %v5287_v1, %v5286_v41  ;;  %v5289_v34 = vpop.f32.mrb[106].mxu0 }
 0x201   : > { %v5354_v61 = vpop.f32.mrb[107].mxu1  ;;  %v5290_v63 = vpop.f32.mrb[107].mxu0 }
 0x202   : > { %v5355_v2 = vadd.f32 %v5354_v61, %v5353_v30  ;;  %v6823_v47 = vadd.f32 %v5352_v32, %v6733_v24  ;;  %v6826_v5 = vadd.f32 %v5288_v46, %v6727_v25  ;;  %v5291_v40 = vadd.f32 %v5290_v63, %v5289_v34 }
 0x204   : > { %v6829_v23 = vadd.f32 %v5355_v2, %v6736_v50  ;;  %v6832_v55 = vadd.f32 %v5291_v40, %v6730_v57 }
 0x206   : > { %v5356_v12 = vpop.f32.mrb[108].mxu1  ;;  %v5292_v3 = vpop.f32.mrb[108].mxu0 }
 0x207   : > { %v5357_v54 = vpop.f32.mrb[109].mxu1  ;;  %v5293_v37 = vpop.f32.mrb[109].mxu0 }
 0x208   : > { %v5358_v4 = vadd.f32 %v5357_v54, %v5356_v12  ;;  %v5359_v62 = vpop.f32.mrb[110].mxu1  ;;  %v5294_v51 = vadd.f32 %v5293_v37, %v5292_v3  ;;  %v5295_v58 = vpop.f32.mrb[110].mxu0 }
 0x209   : > { %v5360_v24 = vpop.f32.mrb[111].mxu1  ;;  %v5296_v50 = vpop.f32.mrb[111].mxu0 }
 0x20a   : > { %v5361_v25 = vadd.f32 %v5360_v24, %v5359_v62  ;;  %v6835_v16 = vadd.f32 %v5358_v4, %v6745_v48  ;;  %v6838_v8 = vadd.f32 %v5294_v51, %v6739_v52  ;;  %v5297_v57 = vadd.f32 %v5296_v50, %v5295_v58 }
 0x20c   : > { %v6841_v15 = vadd.f32 %v5361_v25, %v6748_v7  ;;  %v6848_v29 = vadd.f32 %v5297_v57, %v6742_v36 }
 0x20e   : > { %v5362_v45 = vpop.f32.mrb[112].mxu1  ;;  %v5452_v48 = vpop.f32.mrb[112].mxu0 }
 0x20f   : > { %v5363_v20 = vpop.f32.mrb[113].mxu1  ;;  %v4059_v26 = vadd.f32 %v5452_v48, %v6763_v60  ;;  %v4050_v41 = vpop.f32.mrb[113].mxu0 }
 0x210   : > { %v5364_v38 = vadd.f32 %v5363_v20, %v5362_v45  ;;  %v5365_v52 = vpop.f32.mrb[114].mxu1  ;;  %v4051_v56 = vadd.f32 %v4050_v41, %v6751_v18  ;;  %v5453_v1 = vpop.f32.mrb[114].mxu0 }
 0x211   : > { %v5366_v7 = vpop.f32.mrb[115].mxu1  ;;  %v4186_v36 = vmul.f32 %v6851_v35, %v4059_v26  ;;  %v4062_v46 = vadd.f32 %v5453_v1, %v6769_v49  ;;  %v4053_v34 = vpop.f32.mrb[115].mxu0 }
 0x212   : > { %v5367_v32 = vadd.f32 %v5366_v7, %v5365_v52  ;;  %v6856_v30 = vadd.f32 %v5364_v38, %v6757_v10  ;;  %v4184_v61 = vmul.f32 %v6851_v35, %v4051_v56  ;;  %v4054_v63 = vadd.f32 %v4053_v34, %v6754_v22 }
 0x213   : > { %4218 = vst [vmem:[%s6865_s30 + $0x10] sm:$0xff] %v4186_v36  ;;  %v4187_v18 = vmul.f32 %v6851_v35, %v4062_v46 }
 0x214   : > { %v6863_v60 = vadd.f32 %v5367_v32, %v6760_v14  ;;  %4216 = vst [vmem:[%s6865_s30] sm:$0xff] %v4184_v61  ;;  %v4185_v10 = vmul.f32 %v6851_v35, %v4054_v63 }
 0x215   : > { %4219 = vst [vmem:[%s6865_s30 + $0x18] sm:$0xff] %v4187_v18 }
 0x216   : > { %v5368_v49 = vpop.f32.mrb[116].mxu1  ;;  %4217 = vst [vmem:[%s6865_s30 + $0x8] sm:$0xff] %v4185_v10  ;;  %v5456_v40 = vpop.f32.mrb[116].mxu0 }
 0x217   : > { %v5369_v2 = vpop.f32.mrb[117].mxu1  ;;  %v4075_v54 = vadd.f32 %v5456_v40, %v6787_v28  ;;  %v4066_v3 = vpop.f32.mrb[117].mxu0 }
 0x218   : > { %v5370_v22 = vadd.f32 %v5369_v2, %v5368_v49  ;;  %v5371_v14 = vpop.f32.mrb[118].mxu1  ;;  %v4067_v37 = vadd.f32 %v4066_v3, %v6775_v39  ;;  %v5457_v24 = vpop.f32.mrb[118].mxu0 }
 0x219   : > { %v5372_v12 = vpop.f32.mrb[119].mxu1  ;;  %v4190_v51 = vmul.f32 %v6851_v35, %v4075_v54  ;;  %v4078_v58 = vadd.f32 %v5457_v24, %v6793_v42  ;;  %v4069_v25 = vpop.f32.mrb[119].mxu0 }
 0x21a   : > { %v5373_v4 = vadd.f32 %v5372_v12, %v5371_v14  ;;  %v6875_v62 = vadd.f32 %v5370_v22, %v6766_v43  ;;  %v4188_v28 = vmul.f32 %v6851_v35, %v4067_v37  ;;  %v4070_v57 = vadd.f32 %v4069_v25, %v6781_v17 }
 0x21b   : > { %4222 = vst [vmem:[%s6865_s30 + $0x30] sm:$0xff] %v4190_v51  ;;  %v4191_v43 = vmul.f32 %v6851_v35, %v4078_v58 }
 0x21c   : > { %v6881_v50 = vadd.f32 %v5373_v4, %v6772_v31  ;;  %4220 = vst [vmem:[%s6865_s30 + $0x20] sm:$0xff] %v4188_v28  ;;  %v4189_v45 = vmul.f32 %v6851_v35, %v4070_v57 }
 0x21d   : > { %4223 = vst [vmem:[%s6865_s30 + $0x38] sm:$0xff] %v4191_v43 }
 0x21e   : > { %v5374_v39 = vpop.f32.mrb[120].mxu1  ;;  %4221 = vst [vmem:[%s6865_s30 + $0x28] sm:$0xff] %v4189_v45  ;;  %v5460_v38 = vpop.f32.mrb[120].mxu0 }
 0x21f   : > { %v5375_v20 = vpop.f32.mrb[121].mxu1  ;;  %v4091_v52 = vadd.f32 %v5460_v38, %v6811_v53  ;;  %v4082_v26 = vpop.f32.mrb[121].mxu0 }
 0x220   : > { %v5376_v48 = vadd.f32 %v5375_v20, %v5374_v39  ;;  %v5377_v42 = vpop.f32.mrb[122].mxu1  ;;  %v4083_v7 = vadd.f32 %v4082_v26, %v6799_v19  ;;  %v5461_v56 = vpop.f32.mrb[122].mxu0 }
 0x221   : > { %v5378_v31 = vpop.f32.mrb[123].mxu1  ;;  %v4194_v1 = vmul.f32 %v6851_v35, %v4091_v52  ;;  %v4094_v32 = vadd.f32 %v5461_v56, %v6817_v27  ;;  %v4085_v36 = vpop.f32.mrb[123].mxu0 }
 0x222   : > { %v5379_v17 = vadd.f32 %v5378_v31, %v5377_v42  ;;  %v6893_v41 = vadd.f32 %v5376_v48, %v6778_v21  ;;  %v4192_v53 = vmul.f32 %v6851_v35, %v4083_v7  ;;  %v4086_v34 = vadd.f32 %v4085_v36, %v6805_v13 }
 0x223   : > { %4226 = vst [vmem:[%s6865_s30 + $0x50] sm:$0xff] %v4194_v1  ;;  %v4195_v21 = vmul.f32 %v6851_v35, %v4094_v32 }
 0x224   : > { %v6899_v46 = vadd.f32 %v5379_v17, %v6784_v6  ;;  %4224 = vst [vmem:[%s6865_s30 + $0x40] sm:$0xff] %v4192_v53  ;;  %v4193_v61 = vmul.f32 %v6851_v35, %v4086_v34 }
 0x225   : > { %4227 = vst [vmem:[%s6865_s30 + $0x58] sm:$0xff] %v4195_v21 }
 0x226   : > { %v5380_v19 = vpop.f32.mrb[124].mxu1  ;;  %4225 = vst [vmem:[%s6865_s30 + $0x48] sm:$0xff] %v4193_v61 }
 0x227   : > { %v5381_v63 = vpop.f32.mrb[125].mxu1 }
 0x228   : > { %v5382_v18 = vadd.f32 %v5381_v63, %v5380_v19  ;;  %v5383_v27 = vpop.f32.mrb[126].mxu1 }
 0x229   : > { %v5384_v6 = vpop.f32.mrb[127].mxu1 }
 0x22a   : > { %v5464_v10 = vpop.f32.mrb[124].mxu0  ;;  %v5385_v13 = vadd.f32 %v5384_v6, %v5383_v27  ;;  %v3978_v22 = vadd.f32 %v5382_v18, %v6790_v44 }
 0x22b   : > { %v4107_v49 = vadd.f32 %v5464_v10, %v6835_v16  ;;  %v4098_v2 = vpop.f32.mrb[125].mxu0 }
 0x22c   : > { %v4099_v14 = vadd.f32 %v4098_v2, %v6823_v47  ;;  %v5465_v40 = vpop.f32.mrb[126].mxu0  ;;  %v3981_v4 = vadd.f32 %v5385_v13, %v6796_v33 }
 0x22d   : > { %v4198_v12 = vmul.f32 %v6851_v35, %v4107_v49  ;;  %v4110_v54 = vadd.f32 %v5465_v40, %v6841_v15  ;;  %v4101_v3 = vpop.f32.mrb[127].mxu0 }
 0x22e   : > { %v4196_v37 = vmul.f32 %v6851_v35, %v4099_v14  ;;  %v4102_v16 = vadd.f32 %v4101_v3, %v6829_v23  ;;  %v5386_v51 = vpop.f32.mrb[128].mxu1 }
 0x22f   : > { %4230 = vst [vmem:[%s6865_s30 + $0x70] sm:$0xff] %v4198_v12  ;;  %v4199_v24 = vmul.f32 %v6851_v35, %v4110_v54  ;;  %v5387_v47 = vpop.f32.mrb[129].mxu1 }
 0x230   : > { %4228 = vst [vmem:[%s6865_s30 + $0x60] sm:$0xff] %v4196_v37  ;;  %v4197_v44 = vmul.f32 %v6851_v35, %v4102_v16  ;;  %v5388_v58 = vadd.f32 %v5387_v47, %v5386_v51  ;;  %v5389_v15 = vpop.f32.mrb[130].mxu1 }
 0x231   : > { %4231 = vst [vmem:[%s6865_s30 + $0x78] sm:$0xff] %v4199_v24  ;;  %v5390_v33 = vpop.f32.mrb[131].mxu1 }
 0x232   : > { %4229 = vst [vmem:[%s6865_s30 + $0x68] sm:$0xff] %v4197_v44  ;;  %v5468_v25 = vpop.f32.mrb[128].mxu0  ;;  %v5391_v23 = vadd.f32 %v5390_v33, %v5389_v15  ;;  %v3986_v43 = vadd.f32 %v5388_v58, %v6802_v0 }
 0x233   : > { %v4123_v28 = vadd.f32 %v5468_v25, %v6875_v62  ;;  %v4114_v57 = vpop.f32.mrb[129].mxu0 }
 0x234   : > { %v4115_v45 = vadd.f32 %v4114_v57, %v6856_v30  ;;  %v5469_v39 = vpop.f32.mrb[130].mxu0  ;;  %v3989_v38 = vadd.f32 %v5391_v23, %v6808_v11 }
 0x235   : > { %v4202_v20 = vmul.f32 %v6851_v35, %v4123_v28  ;;  %v4126_v48 = vadd.f32 %v5469_v39, %v6881_v50  ;;  %v4117_v42 = vpop.f32.mrb[131].mxu0 }
 0x236   : > { %v4200_v31 = vmul.f32 %v6851_v35, %v4115_v45  ;;  %v4118_v62 = vadd.f32 %v4117_v42, %v6863_v60  ;;  %v5392_v26 = vpop.f32.mrb[132].mxu1 }
 0x237   : > { %4234 = vst [vmem:[%s6865_s30 + $0x90] sm:$0xff] %v4202_v20  ;;  %v4203_v52 = vmul.f32 %v6851_v35, %v4126_v48  ;;  %v5393_v30 = vpop.f32.mrb[133].mxu1 }
 0x238   : > { %4232 = vst [vmem:[%s6865_s30 + $0x80] sm:$0xff] %v4200_v31  ;;  %v4201_v0 = vmul.f32 %v6851_v35, %v4118_v62  ;;  %v5394_v17 = vadd.f32 %v5393_v30, %v5392_v26  ;;  %v5395_v50 = vpop.f32.mrb[134].mxu1 }
 0x239   : > { %4235 = vst [vmem:[%s6865_s30 + $0x98] sm:$0xff] %v4203_v52  ;;  %v5396_v11 = vpop.f32.mrb[135].mxu1 }
 0x23a   : > { %4233 = vst [vmem:[%s6865_s30 + $0x88] sm:$0xff] %v4201_v0  ;;  %v5472_v7 = vpop.f32.mrb[132].mxu0  ;;  %v5397_v60 = vadd.f32 %v5396_v11, %v5395_v50  ;;  %v3994_v32 = vadd.f32 %v5394_v17, %v6814_v9 }
 0x23b   : > { %v4139_v56 = vadd.f32 %v5472_v7, %v3978_v22  ;;  %v4130_v1 = vpop.f32.mrb[133].mxu0 }
 0x23c   : > { %v4131_v36 = vadd.f32 %v4130_v1, %v6893_v41  ;;  %v5473_v53 = vpop.f32.mrb[134].mxu0  ;;  %v3997_v19 = vadd.f32 %v5397_v60, %v6820_v59 }
 0x23d   : > { %v4206_v34 = vmul.f32 %v6851_v35, %v4139_v56  ;;  %v4142_v21 = vadd.f32 %v5473_v53, %v3981_v4  ;;  %v4133_v61 = vpop.f32.mrb[135].mxu0 }
 0x23e   : > { %v4204_v63 = vmul.f32 %v6851_v35, %v4131_v36  ;;  %v4134_v18 = vadd.f32 %v4133_v61, %v6899_v46  ;;  %v5398_v10 = vpop.f32.mrb[136].mxu1 }
 0x23f   : > { %4238 = vst [vmem:[%s6865_s30 + $0xb0] sm:$0xff] %v4206_v34  ;;  %v4207_v27 = vmul.f32 %v6851_v35, %v4142_v21  ;;  %v5399_v41 = vpop.f32.mrb[137].mxu1 }
 0x240   : > { %4236 = vst [vmem:[%s6865_s30 + $0xa0] sm:$0xff] %v4204_v63  ;;  %v4205_v9 = vmul.f32 %v6851_v35, %v4134_v18  ;;  %v5400_v6 = vadd.f32 %v5399_v41, %v5398_v10  ;;  %v5401_v49 = vpop.f32.mrb[138].mxu1 }
 0x241   : > { %4239 = vst [vmem:[%s6865_s30 + $0xb8] sm:$0xff] %v4207_v27  ;;  %v5402_v59 = vpop.f32.mrb[139].mxu1 }
 0x242   : > { %4237 = vst [vmem:[%s6865_s30 + $0xa8] sm:$0xff] %v4205_v9  ;;  %v5476_v2 = vpop.f32.mrb[136].mxu0  ;;  %v5403_v46 = vadd.f32 %v5402_v59, %v5401_v49  ;;  %v4002_v14 = vadd.f32 %v5400_v6, %v6826_v5 }
 0x243   : > { %v4155_v13 = vadd.f32 %v5476_v2, %v3994_v32  ;;  %v4146_v22 = vpop.f32.mrb[137].mxu0 }
 0x244   : > { %v4147_v40 = vadd.f32 %v4146_v22, %v3986_v43  ;;  %v5477_v12 = vpop.f32.mrb[138].mxu0  ;;  %v4005_v37 = vadd.f32 %v5403_v46, %v6832_v55 }
 0x245   : > { %v4210_v54 = vmul.f32 %v6851_v35, %v4155_v13  ;;  %v4158_v3 = vadd.f32 %v5477_v12, %v3997_v19  ;;  %v4149_v4 = vpop.f32.mrb[139].mxu0 }
 0x246   : > { %v4208_v16 = vmul.f32 %v6851_v35, %v4147_v40  ;;  %v4150_v24 = vadd.f32 %v4149_v4, %v3989_v38 }
 0x247   : > { %4242 = vst [vmem:[%s6865_s30 + $0xd0] sm:$0xff] %v4210_v54  ;;  %v4211_v44 = vmul.f32 %v6851_v35, %v4158_v3 }
 0x248   : > { %4240 = vst [vmem:[%s6865_s30 + $0xc0] sm:$0xff] %v4208_v16  ;;  %v4209_v51 = vmul.f32 %v6851_v35, %v4150_v24 }
 0x249   : > { %4243 = vst [vmem:[%s6865_s30 + $0xd8] sm:$0xff] %v4211_v44 }
 0x24a   : > { %4241 = vst [vmem:[%s6865_s30 + $0xc8] sm:$0xff] %v4209_v51  ;;  %v5480_v25 = vpop.f32.mrb[140].mxu0 }
 0x24b   : > { %v5404_v47 = vpop.f32.mrb[140].mxu1  ;;  %v4162_v28 = vpop.f32.mrb[141].mxu0 }
 0x24c   : > { %v5405_v5 = vpop.f32.mrb[141].mxu1  ;;  %v4163_v23 = vadd.f32 %v4162_v28, %v4002_v14  ;;  %v5481_v43 = vpop.f32.mrb[142].mxu0 }
 0x24d   : > { %v5406_v58 = vadd.f32 %v5405_v5, %v5404_v47  ;;  %v5407_v15 = vpop.f32.mrb[142].mxu1  ;;  %v4165_v20 = vpop.f32.mrb[143].mxu0 }
 0x24e   : > { %v5408_v55 = vpop.f32.mrb[143].mxu1  ;;  %v4212_v48 = vmul.f32 %v6851_v35, %v4163_v23  ;;  %v4166_v42 = vadd.f32 %v4165_v20, %v4005_v37 }
 0x24f   : > { %v4010_v33 = vadd.f32 %v5406_v58, %v6838_v8  ;;  %v5409_v57 = vadd.f32 %v5408_v55, %v5407_v15 }
 0x250   : > { %4244 = vst [vmem:[%s6865_s30 + $0xe0] sm:$0xff] %v4212_v48  ;;  %v4213_v31 = vmul.f32 %v6851_v35, %v4166_v42 }
 0x251   : > { %v4171_v45 = vadd.f32 %v5480_v25, %v4010_v33  ;;  %v4013_v39 = vadd.f32 %v5409_v57, %v6848_v29 }
 0x252   : > { %4245 = vst [vmem:[%s6865_s30 + $0xe8] sm:$0xff] %v4213_v31 }
 0x253   : > { %v4214_v8 = vmul.f32 %v6851_v35, %v4171_v45  ;;  %v4174_v38 = vadd.f32 %v5481_v43, %v4013_v39 }
 0x255   : > { %4246 = vst [vmem:[%s6865_s30 + $0xf0] sm:$0xff] %v4214_v8  ;;  %v4215_v29 = vmul.f32 %v6851_v35, %v4174_v38 }
 0x257   : > { %4247 = vst [vmem:[%s6865_s30 + $0xf8] sm:$0xff] %v4215_v29 }
 0x258   : > { %5923 = shalt.err (!%p5920_p6)
}
 0x259   : > { %s5924_s9 = scalar_lea.hbm %s6970_s19, 4096  ;;  %s5928_s23 = scalar_lea.hbm %s7028_s3, 8192 }
 0x25a   : > { %p5925_p7 = scmp.ne.s32.totalorder %s6970_s19, %s5924_s9  ;;  %p5929_p1 = scmp.lt.u32.totalorder %s6970_s19, %s7028_s3 }
 0x25b   : > { %p5930_p3 = scmp.lt.u32.totalorder %s5928_s23, %s5924_s9  ;;  %p5932_p8 = scmp.lt.u32.totalorder %s5924_s9, %s6970_s19 }
 0x25c   : > { %p5926_p10 = pnand %p5925_p7, %p7036_p11 }
 0x25d   : > { %p5931_p9 = por %p5930_p3, %p5929_p1 }
 0x25e   : > { %p5927_p12 = pneg %p5926_p10 }
 0x25f   : > { %p5933_p0 = por %p5932_p8, %p5931_p9 }
 0x261   : > { %p5934_p5 = pnand %p5933_p0, %p5927_p12 }
 0x263   : > { %5937 = shalt.err (!%p5934_p5)
}
 0x264   : > { %s5998_s30 = smov 128   ;;  %s5999_s5 = smov 8  }
 0x265   : > { %5504 = dma.vmem_to_hbm [thread:$0]  (%p7036_p11), %s6972_s6, 4096, %s6970_s19, %s4249_s15, %s5998_s30, %s5998_s30, %s5999_s5  }
 0x266 PF: > { %s4279_s8 = sand.u32 1, %s5972_s12   ;;  %p7037_p13 = scmp.ne.s32.totalorder %s7033_s27, 0 }
 0x267   : > { %p7038_p2 = scmp.ge.s32.totalorder %s5992_s17, 2  ;;  %s4280_s18 = scalar_lea.sflag [#allocation5], %s4279_s8 }
 0x269   : > { %p5511_p4 = pnand %p7038_p2, %p7037_p13 }
 0x26b   : > { %5967 = dma.done.wait (!%p5511_p4), %s4280_s18, 4096  }
 0x26c   : > { %5969 = vsyncadd (!%p5511_p4), %s4280_s18, 4294963200  ;;  %s19_s17 = sadd.s32 1, %s5992_s17   ;;  %s7039_s12 = smov %s5976_s13 }
 0x26d   : > { %p16_p6 = scmp.ge.s32.totalorder %s19_s17, 4   ;;  %s7040_s13 = smov %s5980_s14 }
 0x26e   : > { %s7041_s14 = smov %s6076_s26  ;;  %s7042_s15 = smov %s5988_s16 }
 0x26f   : > { %s7043_s16 = smov %s7045_s20  ;;  %18 = sbr.rel (!%p16_p6) target bundleno = 6 (0x6), region = 86 }
 0x276   :  { %4285 = vsyncpa [#allocation4], 1 }
 0x277   :  { %4287 = vsyncpa [#allocation4 + $0x1], 1 }
 0x278   :  { %4288 = vsyncpa [#allocation5], 1 }
 0x279   :  { %4290 = vsyncpa [#allocation5 + $0x1], 1 }

</bundles_post_ra>
